<compile_context>
chip_gen: v7x
topology: tpu7x:2x2x1
jax: 0.10.0
libtpu: 0.0.40
codegen_flags: <defaults>
</compile_context>

<pallas_src>
import functools

import numpy as np
import jax
import jax.numpy as jnp
from jax.experimental import pallas as pl
from jax.experimental.pallas import tpu as pltpu

N_FEATURES = 128
RESOLUTION = 20
CUTOFF = 5.0
CUTOFF_P = 9  # PolynomialCutoff(cutoff, p=9)


# ----------------------------------------------------------------------------
# Pallas kernel: embedding-pair init + MessagePassing (n_interax=1) +
# AtomicProperty / PairProperty MLPs.
# ----------------------------------------------------------------------------
def _genmp_kernel(n_atoms, n_neigh_pad,
                  a0_ref, rbf_ref, d_ref, nm_ref, nidx_ref,
                  w_rbf_ref, b_rbf_ref, wa1_ref, ba1_ref, wa2_ref, ba2_ref,
                  wA1_ref, bA1_ref, wA2_ref, bA2_ref, wA3_ref, bA3_ref,
                  wP1_ref, bP1_ref, wP2_ref, bP2_ref, wP3_ref, bP3_ref,
                  a_out_ref, atom_out_ref, pair_out_ref):
    f32 = jnp.float32
    bf16 = jnp.bfloat16
    silu = lambda x: x * jax.nn.sigmoid(x)          # nn.SiLU()

    A = a_out_ref.shape[0]
    F = a_out_ref.shape[1]
    NP = n_neigh_pad
    ANP = A * NP

    a0 = a0_ref[...]                                # (A, F) bf16

    # Neighbor one-hot built on-chip from int32 indices (VPU compare), bf16
    # so the gather matmul runs at the fast MXU rate.  No HBM one-hot traffic.
    col = jax.lax.broadcasted_iota(jnp.int32, (ANP, A), 1)
    n_oh = jnp.where(col == nidx_ref[...], 1.0, 0.0).astype(bf16)   # (ANP, A)

    # Per-atom broadcast over the (contiguous, NP-padded) neighbor rows.
    # NP is a multiple of 8, so (A, NP, F) <-> (A*NP, F) is sublane-aligned.
    def bcast_rows(x_f32):                          # (A, F) f32 -> (ANP, F) f32
        return jnp.broadcast_to(x_f32[:, None, :], (A, NP, F)).reshape(ANP, F)

    # ---- initial pair features: p = ai * aj --------------------------------
    ai0 = bcast_rows(a0.astype(f32))
    aj0 = jnp.dot(n_oh, a0, preferred_element_type=f32)     # gather as matmul
    p = ai0 * aj0                                           # (ANP, F) f32

    # ---- MessagePassing (single interaction, n_interax = 1) ----------------
    # phi_rbf: Dense(resolution -> F, no activation)
    rbf_m = (jnp.dot(rbf_ref[...], w_rbf_ref[...], preferred_element_type=f32)
             + b_rbf_ref[...])

    # PolynomialCutoff(cutoff, p=9) with shared powers, fused with the
    # neighbor mask so msij needs no second (ANP, F) multiply.
    x = d_ref[...] * (1.0 / CUTOFF)                 # (ANP, 1)
    x2 = x * x
    x4 = x2 * x2
    x8 = x4 * x4
    x9 = x8 * x
    x10 = x9 * x
    x11 = x10 * x
    env = 1.0 - 55.0 * x9 + 99.0 * x10 - 45.0 * x11
    mask = jnp.where(x < 1.0, env, 0.0) * nm_ref[...]
    rbf_m = rbf_m * mask

    # phi_a: Dense(F,F,SiLU) -> Dense(F,F,None)
    h = silu(jnp.dot(a0, wa1_ref[...], preferred_element_type=f32) + ba1_ref[...])
    a_m = jnp.dot(h.astype(bf16), wa2_ref[...], preferred_element_type=f32) + ba2_ref[...]

    ai_m = bcast_rows(a_m)                                           # broadcast
    aj_m = jnp.dot(n_oh, a_m.astype(bf16), preferred_element_type=f32)  # gather
    msij = ai_m * aj_m * rbf_m                      # env & NM already folded in

    # neighbor-sum is tile-local: reshape + reduce over the padded axis
    a_sum = jnp.sum(msij.reshape(A, NP, F), axis=1)          # (A, F)
    # Faithful reproduction of the source: `a` is shadowed by n_atoms, so
    # a = n_atoms + sum(msij, dim=2)  (previous atom features are dropped).
    a_new = jnp.float32(n_atoms) + a_sum
    p = p + msij

    a_out_ref[...] = a_new

    # ---- AtomicProperty MLP: F -> 128 -> 64 -> 1 ----------------------------
    hA = silu(jnp.dot(a_new.astype(bf16), wA1_ref[...], preferred_element_type=f32)
              + bA1_ref[...])
    hA = silu(jnp.dot(hA.astype(bf16), wA2_ref[...], preferred_element_type=f32)
              + bA2_ref[...])
    # final 64 -> 1 as VPU multiply + lane reduction (skips a skinny MXU matmul)
    atom_out_ref[...] = jnp.sum(hA * wA3_ref[...], axis=-1, keepdims=True) + bA3_ref[...]

    # ---- PairProperty MLP: F -> 128 -> 64 -> 1 ------------------------------
    hP = silu(jnp.dot(p.astype(bf16), wP1_ref[...], preferred_element_type=f32)
              + bP1_ref[...])
    hP = silu(jnp.dot(hP.astype(bf16), wP2_ref[...], preferred_element_type=f32)
              + bP2_ref[...])
    pair_out_ref[...] = jnp.sum(hP * wP3_ref[...], axis=-1, keepdims=True) + bP3_ref[...]


def genmp_pallas(params, a_emb, rbf_flat, d_flat, nm_flat, nidx_flat,
                 n_atoms, n_neigh_pad):
    n_batch = a_emb.shape[0]
    A = n_atoms
    F = N_FEATURES
    ANP = A * n_neigh_pad
    R = rbf_flat.shape[-1]
    bf16 = jnp.bfloat16
    f32 = jnp.float32

    # MXU operands in bf16 (f32 accumulation in-kernel); biases stay f32.
    w_list = [
        params['w_rbf'].astype(bf16), params['b_rbf'].astype(f32),
        params['wa1'].astype(bf16), params['ba1'].astype(f32),
        params['wa2'].astype(bf16), params['ba2'].astype(f32),
        params['wA1'].astype(bf16), params['bA1'].astype(f32),
        params['wA2'].astype(bf16), params['bA2'].astype(f32),
        params['wA3'].reshape(1, -1).astype(f32), params['bA3'].astype(f32),
        params['wP1'].astype(bf16), params['bP1'].astype(f32),
        params['wP2'].astype(bf16), params['bP2'].astype(f32),
        params['wP3'].reshape(1, -1).astype(f32), params['bP3'].astype(f32),
    ]

    def per_batch(shape):
        return pl.BlockSpec((None,) + shape, lambda b: (b,) + (0,) * len(shape))

    def bcast(arr):
        return pl.BlockSpec(arr.shape, lambda b: (0,) * arr.ndim)

    in_specs = [per_batch((A, F)),
                per_batch((ANP, R)),
                per_batch((ANP, 1)),
                per_batch((ANP, 1)),
                per_batch((ANP, 1))] + [bcast(w) for w in w_list]

    out_shapes = (jax.ShapeDtypeStruct((n_batch, A, F), f32),
                  jax.ShapeDtypeStruct((n_batch, A, 1), f32),
                  jax.ShapeDtypeStruct((n_batch, ANP, 1), f32))
    out_specs = (per_batch((A, F)),
                 per_batch((A, 1)),
                 per_batch((ANP, 1)))

    kernel = functools.partial(_genmp_kernel, n_atoms, n_neigh_pad)
    return pl.pallas_call(
        kernel,
        grid=(n_batch,),
        in_specs=in_specs,
        out_specs=out_specs,
        out_shape=out_shapes,
        compiler_params=pltpu.CompilerParams(
            dimension_semantics=("parallel",),
            vmem_limit_bytes=32 * 1024 * 1024),
    )(a_emb, rbf_flat, d_flat, nm_flat, nidx_flat, *w_list)


# ----------------------------------------------------------------------------
# Plain-JAX glue: shell distances, radial basis, embedding lookup, A assembly.
# ----------------------------------------------------------------------------
def genmp_forward(params, R, Z, N, NM):
    n_batch, n_atoms, n_neigh = N.shape
    NP = ((n_neigh + 7) // 8) * 8          # pad neighbor axis to sublane multiple

    # TODO(synk): ShellProvider (shell_cutoff=10.0) source unavailable; we only
    # compute D, V from (R, N) and pass N, NM through unchanged.
    batch_idx = jnp.arange(n_batch)[:, None, None]
    Rj = R[batch_idx, N]                        # (b, A, Nn, 3)
    V = Rj - R[:, :, None, :]
    D = jnp.sqrt(jnp.sum(V * V, axis=-1))       # (b, A, Nn)

    # NaN guard: masked / zero-distance neighbors must not poison sin(x)/x.
    D_safe = jnp.where(D > 1e-12, D, 1.0)

    # TODO(synk): RadialBesselLayer source unavailable; standard Bessel basis
    # sqrt(2/c) * sin(n*pi*d/c) / d, n = 1..resolution, used as glue.
    n = jnp.arange(1, RESOLUTION + 1, dtype=jnp.float32)
    rbf = (jnp.sqrt(2.0 / CUTOFF)
           * jnp.sin(n * jnp.pi * D_safe[..., None] / CUTOFF) / D_safe[..., None])

    # atom embedding (padding_idx=0 row is zero)
    a = params['atom_embedding'][Z]             # (b, A, F)

    # pad the neighbor axis so pair rows per atom fill whole 8-row tiles;
    # padded slots get NM=0 (so msij=0) and are sliced off afterwards.
    pad = NP - n_neigh
    N_p = jnp.pad(N, ((0, 0), (0, 0), (0, pad)))
    NM_p = jnp.pad(NM, ((0, 0), (0, 0), (0, pad)))
    D_p = jnp.pad(D_safe, ((0, 0), (0, 0), (0, pad)), constant_values=1.0)
    rbf_p = jnp.pad(rbf, ((0, 0), (0, 0), (0, pad), (0, 0)))

    ANP = n_atoms * NP
    rbf_flat = rbf_p.reshape(n_batch, ANP, RESOLUTION).astype(jnp.bfloat16)
    d_flat = D_p.reshape(n_batch, ANP, 1).astype(jnp.float32)
    nm_flat = NM_p.reshape(n_batch, ANP, 1).astype(jnp.float32)
    nidx_flat = N_p.reshape(n_batch, ANP, 1).astype(jnp.int32)

    a_out, atom_pred, pair_pred = genmp_pallas(
        params, a.astype(jnp.bfloat16), rbf_flat, d_flat, nm_flat, nidx_flat,
        n_atoms, NP)

    Ai = atom_pred[..., 0]                                            # (b, A)
    Pij = pair_pred.reshape(n_batch, n_atoms, NP)[:, :, :n_neigh]     # (b, A, Nn)

    # graph matrix: off-diagonal filled row-major with Pij, diagonal = Ai
    # (positional fill, exactly matching the torch boolean-mask assignment).
    i = jnp.arange(n_atoms)[:, None]
    k = jnp.arange(n_neigh)[None, :]
    col = k + (k >= i)
    A_mat = jnp.zeros((n_batch, n_atoms, n_atoms), jnp.float32)
    A_mat = A_mat.at[:, i, col].set(Pij)
    diag = jnp.arange(n_atoms)
    A_mat = A_mat.at[:, diag, diag].set(Ai)

    # TODO(synk): torch.linalg.eig (general complex eigendecomposition) and
    # grad(E(G), R) have no TPU/Pallas equivalent; eigvals are computed on host
    # with numpy in __main__, F(G) is omitted.
    return {'R': R, 'Z': Z, 'N': N, 'NM': NM, 'D': D, 'V': V,
            'Ai': Ai, 'Pij': Pij, 'A': A_mat, 'a': a_out}


def init_params(key):
    ks = jax.random.split(key, 10)

    def dense(k, fi, fo):
        kw, kb = jax.random.split(k)
        w = jax.random.normal(kw, (fi, fo), jnp.float32) / np.sqrt(fi)
        b = 0.01 * jax.random.normal(kb, (1, fo), jnp.float32)
        return w.astype(jnp.float32), b

    p = {}
    emb = jax.random.normal(ks[0], (10, N_FEATURES), jnp.float32)
    p['atom_embedding'] = emb.at[0].set(0.0)     # padding_idx=0
    p['w_rbf'], p['b_rbf'] = dense(ks[1], RESOLUTION, N_FEATURES)
    p['wa1'], p['ba1'] = dense(ks[2], N_FEATURES, N_FEATURES)
    p['wa2'], p['ba2'] = dense(ks[3], N_FEATURES, N_FEATURES)
    p['wA1'], p['bA1'] = dense(ks[4], N_FEATURES, 128)
    p['wA2'], p['bA2'] = dense(ks[5], 128, 64)
    p['wA3'], p['bA3'] = dense(ks[6], 64, 1)
    p['wP1'], p['bP1'] = dense(ks[7], N_FEATURES, 128)
    p['wP2'], p['bP2'] = dense(ks[8], 128, 64)
    p['wP3'], p['bP3'] = dense(ks[9], 64, 1)
    return p


if __name__ == "__main__":
    key = jax.random.PRNGKey(0)
    kp, kr, kz = jax.random.split(key, 3)
    params = init_params(kp)

    n_batch, n_atoms = 2, 8
    n_neigh = n_atoms - 1
    R = 2.0 * jax.random.normal(kr, (n_batch, n_atoms, 3), jnp.float32)
    Z = jax.random.randint(kz, (n_batch, n_atoms), 1, 10)
    # neighbor list: every other atom, in increasing index order
    N_np = np.array([[j for j in range(n_atoms) if j != i] for i in range(n_atoms)],
                    dtype=np.int32)
    N = jnp.broadcast_to(jnp.asarray(N_np)[None], (n_batch, n_atoms, n_neigh))
    NM = jnp.ones((n_batch, n_atoms, n_neigh), jnp.float32).at[1, -1, -1].set(0.0)

    out = jax.block_until_ready(genmp_forward(params, R, Z, N, NM))

    # host-side eigendecomposition of the (tiny) graph matrix
    A_host = np.asarray(out['A'], dtype=np.float64)
    eigval, eigvec = np.linalg.eig(A_host)
    graph_energy = eigval.real.sum(axis=-1, keepdims=True)
    out.update({'E(G)': graph_energy, 'E(val)': eigval, 'E(vec)': eigvec})

    assert out['Ai'].shape == (n_batch, n_atoms)
    assert out['Pij'].shape == (n_batch, n_atoms, n_neigh)
    assert out['E(G)'].shape == (n_batch, 1)
    assert np.isfinite(np.asarray(out['Ai'])).all()
    assert np.isfinite(np.asarray(out['Pij'])).all()
    print("KERNEL_OK")
</pallas_src>

<mosaic_0001>
module attributes {stable_mosaic.version = 11 : i64} {
  func.func @_genmp_kernel(%arg0: i32, %arg1: memref<1x8x128xbf16, #tpu.memory_space<vmem>>, %arg2: memref<1x64x20xbf16, #tpu.memory_space<vmem>>, %arg3: memref<1x64x1xf32, #tpu.memory_space<vmem>>, %arg4: memref<1x64x1xf32, #tpu.memory_space<vmem>>, %arg5: memref<1x64x1xi32, #tpu.memory_space<vmem>>, %arg6: memref<20x128xbf16, #tpu.memory_space<vmem>>, %arg7: memref<1x128xf32, #tpu.memory_space<vmem>>, %arg8: memref<128x128xbf16, #tpu.memory_space<vmem>>, %arg9: memref<1x128xf32, #tpu.memory_space<vmem>>, %arg10: memref<128x128xbf16, #tpu.memory_space<vmem>>, %arg11: memref<1x128xf32, #tpu.memory_space<vmem>>, %arg12: memref<128x128xbf16, #tpu.memory_space<vmem>>, %arg13: memref<1x128xf32, #tpu.memory_space<vmem>>, %arg14: memref<128x64xbf16, #tpu.memory_space<vmem>>, %arg15: memref<1x64xf32, #tpu.memory_space<vmem>>, %arg16: memref<1x64xf32, #tpu.memory_space<vmem>>, %arg17: memref<1x1xf32, #tpu.memory_space<vmem>>, %arg18: memref<128x128xbf16, #tpu.memory_space<vmem>>, %arg19: memref<1x128xf32, #tpu.memory_space<vmem>>, %arg20: memref<128x64xbf16, #tpu.memory_space<vmem>>, %arg21: memref<1x64xf32, #tpu.memory_space<vmem>>, %arg22: memref<1x64xf32, #tpu.memory_space<vmem>>, %arg23: memref<1x1xf32, #tpu.memory_space<vmem>>, %arg24: memref<1x8x128xf32, #tpu.memory_space<vmem>>, %arg25: memref<1x8x1xf32, #tpu.memory_space<vmem>>, %arg26: memref<1x64x1xf32, #tpu.memory_space<vmem>>) attributes {dimension_semantics = [#tpu.dimension_semantics<parallel>], iteration_bounds = array<i64: 2>, scalar_prefetch = 0 : i64, scratch_operands = 0 : i64, tpu.core_type = #tpu.core_type<tc>, window_params = [{transform_indices = @transform_0, window_bounds = array<i64: 1, 8, 128>}, {transform_indices = @transform_1, window_bounds = array<i64: 1, 64, 20>}, {transform_indices = @transform_2, window_bounds = array<i64: 1, 64, 1>}, {transform_indices = @transform_3, window_bounds = array<i64: 1, 64, 1>}, {transform_indices = @transform_4, window_bounds = array<i64: 1, 64, 1>}, {pipeline_mode = #tpu.pipeline_mode<synchronous>, transform_indices = @transform_5, window_bounds = array<i64: 20, 128>}, {pipeline_mode = #tpu.pipeline_mode<synchronous>, transform_indices = @transform_6, window_bounds = array<i64: 1, 128>}, {pipeline_mode = #tpu.pipeline_mode<synchronous>, transform_indices = @transform_7, window_bounds = array<i64: 128, 128>}, {pipeline_mode = #tpu.pipeline_mode<synchronous>, transform_indices = @transform_8, window_bounds = array<i64: 1, 128>}, {pipeline_mode = #tpu.pipeline_mode<synchronous>, transform_indices = @transform_9, window_bounds = array<i64: 128, 128>}, {pipeline_mode = #tpu.pipeline_mode<synchronous>, transform_indices = @transform_10, window_bounds = array<i64: 1, 128>}, {pipeline_mode = #tpu.pipeline_mode<synchronous>, transform_indices = @transform_11, window_bounds = array<i64: 128, 128>}, {pipeline_mode = #tpu.pipeline_mode<synchronous>, transform_indices = @transform_12, window_bounds = array<i64: 1, 128>}, {pipeline_mode = #tpu.pipeline_mode<synchronous>, transform_indices = @transform_13, window_bounds = array<i64: 128, 64>}, {pipeline_mode = #tpu.pipeline_mode<synchronous>, transform_indices = @transform_14, window_bounds = array<i64: 1, 64>}, {pipeline_mode = #tpu.pipeline_mode<synchronous>, transform_indices = @transform_15, window_bounds = array<i64: 1, 64>}, {pipeline_mode = #tpu.pipeline_mode<synchronous>, transform_indices = @transform_16, window_bounds = array<i64: 1, 1>}, {pipeline_mode = #tpu.pipeline_mode<synchronous>, transform_indices = @transform_17, window_bounds = array<i64: 128, 128>}, {pipeline_mode = #tpu.pipeline_mode<synchronous>, transform_indices = @transform_18, window_bounds = array<i64: 1, 128>}, {pipeline_mode = #tpu.pipeline_mode<synchronous>, transform_indices = @transform_19, window_bounds = array<i64: 128, 64>}, {pipeline_mode = #tpu.pipeline_mode<synchronous>, transform_indices = @transform_20, window_bounds = array<i64: 1, 64>}, {pipeline_mode = #tpu.pipeline_mode<synchronous>, transform_indices = @transform_21, window_bounds = array<i64: 1, 64>}, {pipeline_mode = #tpu.pipeline_mode<synchronous>, transform_indices = @transform_22, window_bounds = array<i64: 1, 1>}, {transform_indices = @transform_23, window_bounds = array<i64: 1, 8, 128>}, {transform_indices = @transform_24, window_bounds = array<i64: 1, 8, 1>}, {transform_indices = @transform_25, window_bounds = array<i64: 1, 64, 1>}]} {
    %c0 = arith.constant 0 : index
    %c0_0 = arith.constant 0 : index
    %c0_1 = arith.constant 0 : index
    %0 = vector.load %arg1[%c0, %c0_0, %c0_1] : memref<1x8x128xbf16, #tpu.memory_space<vmem>>, vector<1x8x128xbf16>
    %1 = vector.shape_cast %0 : vector<1x8x128xbf16> to vector<8x128xbf16>
    %2 = tpu.iota {dimensions = array<i32: 1>} : vector<64x8xi32>
    %c0_2 = arith.constant 0 : index
    %c0_3 = arith.constant 0 : index
    %c0_4 = arith.constant 0 : index
    %3 = vector.load %arg5[%c0_2, %c0_3, %c0_4] : memref<1x64x1xi32, #tpu.memory_space<vmem>>, vector<1x64x1xi32>
    %4 = vector.shape_cast %3 : vector<1x64x1xi32> to vector<64x1xi32>
    %5 = vector.broadcast %4 : vector<64x1xi32> to vector<64x8xi32>
    %6 = arith.cmpi eq, %2, %5 : vector<64x8xi32>
    %cst = arith.constant 1.000000e+00 : f32
    %cst_5 = arith.constant 0.000000e+00 : f32
    %7 = vector.broadcast %cst : f32 to vector<64x8xf32>
    %8 = vector.broadcast %cst_5 : f32 to vector<64x8xf32>
    %9 = arith.select %6, %7, %8 : vector<64x8xi1>, vector<64x8xf32>
    %10 = arith.truncf %9 : vector<64x8xf32> to vector<64x8xbf16>
    %11 = arith.extf %1 : vector<8x128xbf16> to vector<8x128xf32>
    %12 = vector.shape_cast %11 : vector<8x128xf32> to vector<8x1x128xf32>
    %13 = vector.shape_cast %12 : vector<8x1x128xf32> to vector<8x1x128xf32>
    %14 = vector.broadcast %13 : vector<8x1x128xf32> to vector<8x8x128xf32>
    %15 = vector.shape_cast %14 : vector<8x8x128xf32> to vector<64x128xf32>
    %cst_6 = arith.constant dense<0.000000e+00> : vector<64x128xf32>
    %16 = tpu.matmul %10, %1, %cst_6 {dimension_numbers = #tpu.dot_dimension_numbers<[1], [0], [0], [1], [0, 0, 1, 1], [], []>} : vector<64x8xbf16>, vector<8x128xbf16>, vector<64x128xf32> -> vector<64x128xf32>
    %17 = arith.mulf %15, %16 : vector<64x128xf32>
    %c0_7 = arith.constant 0 : index
    %c0_8 = arith.constant 0 : index
    %c0_9 = arith.constant 0 : index
    %18 = vector.load %arg2[%c0_7, %c0_8, %c0_9] : memref<1x64x20xbf16, #tpu.memory_space<vmem>>, vector<1x64x20xbf16>
    %19 = vector.shape_cast %18 : vector<1x64x20xbf16> to vector<64x20xbf16>
    %c0_10 = arith.constant 0 : index
    %c0_11 = arith.constant 0 : index
    %20 = vector.load %arg6[%c0_10, %c0_11] : memref<20x128xbf16, #tpu.memory_space<vmem>>, vector<20x128xbf16>
    %cst_12 = arith.constant dense<0.000000e+00> : vector<64x128xf32>
    %21 = tpu.matmul %19, %20, %cst_12 {dimension_numbers = #tpu.dot_dimension_numbers<[1], [0], [0], [1], [0, 0, 1, 1], [], []>} : vector<64x20xbf16>, vector<20x128xbf16>, vector<64x128xf32> -> vector<64x128xf32>
    %c0_13 = arith.constant 0 : index
    %c0_14 = arith.constant 0 : index
    %22 = vector.load %arg7[%c0_13, %c0_14] : memref<1x128xf32, #tpu.memory_space<vmem>>, vector<1x128xf32>
    %23 = vector.broadcast %22 : vector<1x128xf32> to vector<64x128xf32>
    %24 = arith.addf %21, %23 : vector<64x128xf32>
    %c0_15 = arith.constant 0 : index
    %c0_16 = arith.constant 0 : index
    %c0_17 = arith.constant 0 : index
    %25 = vector.load %arg3[%c0_15, %c0_16, %c0_17] : memref<1x64x1xf32, #tpu.memory_space<vmem>>, vector<1x64x1xf32>
    %26 = vector.shape_cast %25 : vector<1x64x1xf32> to vector<64x1xf32>
    %cst_18 = arith.constant 2.000000e-01 : f32
    %27 = vector.broadcast %cst_18 : f32 to vector<64x1xf32>
    %28 = arith.mulf %26, %27 : vector<64x1xf32>
    %29 = arith.mulf %28, %28 : vector<64x1xf32>
    %30 = arith.mulf %29, %29 : vector<64x1xf32>
    %31 = arith.mulf %30, %30 : vector<64x1xf32>
    %32 = arith.mulf %31, %28 : vector<64x1xf32>
    %33 = arith.mulf %32, %28 : vector<64x1xf32>
    %34 = arith.mulf %33, %28 : vector<64x1xf32>
    %cst_19 = arith.constant 5.500000e+01 : f32
    %35 = vector.broadcast %cst_19 : f32 to vector<64x1xf32>
    %36 = arith.mulf %35, %32 : vector<64x1xf32>
    %cst_20 = arith.constant 1.000000e+00 : f32
    %37 = vector.broadcast %cst_20 : f32 to vector<64x1xf32>
    %38 = arith.subf %37, %36 : vector<64x1xf32>
    %cst_21 = arith.constant 9.900000e+01 : f32
    %39 = vector.broadcast %cst_21 : f32 to vector<64x1xf32>
    %40 = arith.mulf %39, %33 : vector<64x1xf32>
    %41 = arith.addf %38, %40 : vector<64x1xf32>
    %cst_22 = arith.constant 4.500000e+01 : f32
    %42 = vector.broadcast %cst_22 : f32 to vector<64x1xf32>
    %43 = arith.mulf %42, %34 : vector<64x1xf32>
    %44 = arith.subf %41, %43 : vector<64x1xf32>
    %cst_23 = arith.constant 1.000000e+00 : f32
    %45 = vector.broadcast %cst_23 : f32 to vector<64x1xf32>
    %46 = arith.cmpf olt, %28, %45 : vector<64x1xf32>
    %cst_24 = arith.constant 0.000000e+00 : f32
    %47 = vector.broadcast %cst_24 : f32 to vector<64x1xf32>
    %48 = arith.select %46, %44, %47 : vector<64x1xi1>, vector<64x1xf32>
    %c0_25 = arith.constant 0 : index
    %c0_26 = arith.constant 0 : index
    %c0_27 = arith.constant 0 : index
    %49 = vector.load %arg4[%c0_25, %c0_26, %c0_27] : memref<1x64x1xf32, #tpu.memory_space<vmem>>, vector<1x64x1xf32>
    %50 = vector.shape_cast %49 : vector<1x64x1xf32> to vector<64x1xf32>
    %51 = arith.mulf %48, %50 : vector<64x1xf32>
    %52 = vector.broadcast %51 : vector<64x1xf32> to vector<64x128xf32>
    %53 = arith.mulf %24, %52 : vector<64x128xf32>
    %c0_28 = arith.constant 0 : index
    %c0_29 = arith.constant 0 : index
    %54 = vector.load %arg8[%c0_28, %c0_29] : memref<128x128xbf16, #tpu.memory_space<vmem>>, vector<128x128xbf16>
    %cst_30 = arith.constant dense<0.000000e+00> : vector<8x128xf32>
    %55 = tpu.matmul %1, %54, %cst_30 {dimension_numbers = #tpu.dot_dimension_numbers<[1], [0], [0], [1], [0, 0, 1, 1], [], []>} : vector<8x128xbf16>, vector<128x128xbf16>, vector<8x128xf32> -> vector<8x128xf32>
    %c0_31 = arith.constant 0 : index
    %c0_32 = arith.constant 0 : index
    %56 = vector.load %arg9[%c0_31, %c0_32] : memref<1x128xf32, #tpu.memory_space<vmem>>, vector<1x128xf32>
    %57 = vector.broadcast %56 : vector<1x128xf32> to vector<8x128xf32>
    %58 = arith.addf %55, %57 : vector<8x128xf32>
    %59 = arith.negf %58 : vector<8x128xf32>
    %60 = math.exp %59 : vector<8x128xf32>
    %cst_33 = arith.constant 1.000000e+00 : f32
    %61 = vector.broadcast %cst_33 : f32 to vector<8x128xf32>
    %62 = arith.addf %61, %60 : vector<8x128xf32>
    %63 = arith.divf %61, %62 : vector<8x128xf32>
    %64 = arith.mulf %58, %63 : vector<8x128xf32>
    %65 = arith.truncf %64 : vector<8x128xf32> to vector<8x128xbf16>
    %c0_34 = arith.constant 0 : index
    %c0_35 = arith.constant 0 : index
    %66 = vector.load %arg10[%c0_34, %c0_35] : memref<128x128xbf16, #tpu.memory_space<vmem>>, vector<128x128xbf16>
    %cst_36 = arith.constant dense<0.000000e+00> : vector<8x128xf32>
    %67 = tpu.matmul %65, %66, %cst_36 {dimension_numbers = #tpu.dot_dimension_numbers<[1], [0], [0], [1], [0, 0, 1, 1], [], []>} : vector<8x128xbf16>, vector<128x128xbf16>, vector<8x128xf32> -> vector<8x128xf32>
    %c0_37 = arith.constant 0 : index
    %c0_38 = arith.constant 0 : index
    %68 = vector.load %arg11[%c0_37, %c0_38] : memref<1x128xf32, #tpu.memory_space<vmem>>, vector<1x128xf32>
    %69 = vector.broadcast %68 : vector<1x128xf32> to vector<8x128xf32>
    %70 = arith.addf %67, %69 : vector<8x128xf32>
    %71 = vector.shape_cast %70 : vector<8x128xf32> to vector<8x1x128xf32>
    %72 = vector.shape_cast %71 : vector<8x1x128xf32> to vector<8x1x128xf32>
    %73 = vector.broadcast %72 : vector<8x1x128xf32> to vector<8x8x128xf32>
    %74 = vector.shape_cast %73 : vector<8x8x128xf32> to vector<64x128xf32>
    %75 = arith.truncf %70 : vector<8x128xf32> to vector<8x128xbf16>
    %cst_39 = arith.constant dense<0.000000e+00> : vector<64x128xf32>
    %76 = tpu.matmul %10, %75, %cst_39 {dimension_numbers = #tpu.dot_dimension_numbers<[1], [0], [0], [1], [0, 0, 1, 1], [], []>} : vector<64x8xbf16>, vector<8x128xbf16>, vector<64x128xf32> -> vector<64x128xf32>
    %77 = arith.mulf %74, %76 : vector<64x128xf32>
    %78 = arith.mulf %77, %53 : vector<64x128xf32>
    %79 = vector.shape_cast %78 : vector<64x128xf32> to vector<8x8x128xf32>
    %cst_40 = arith.constant dense<0.000000e+00> : vector<8x128xf32>
    %80 = vector.multi_reduction <add>, %79, %cst_40 [1] : vector<8x8x128xf32> to vector<8x128xf32>
    %cst_41 = arith.constant 8.000000e+00 : f32
    %81 = vector.broadcast %cst_41 : f32 to vector<8x128xf32>
    %82 = arith.addf %81, %80 : vector<8x128xf32>
    %83 = arith.addf %17, %78 : vector<64x128xf32>
    %c0_42 = arith.constant 0 : index
    %c0_43 = arith.constant 0 : index
    %c0_44 = arith.constant 0 : index
    %84 = vector.load %arg24[%c0_42, %c0_43, %c0_44] : memref<1x8x128xf32, #tpu.memory_space<vmem>>, vector<1x8x128xf32>
    %85 = vector.shape_cast %84 : vector<1x8x128xf32> to vector<8x128xf32>
    %86 = vector.shape_cast %82 : vector<8x128xf32> to vector<1x8x128xf32>
    tpu.vector_store %arg24[%c0_42, %c0_43, %c0_44], %86 {strides = array<i32>} : memref<1x8x128xf32, #tpu.memory_space<vmem>>, vector<1x8x128xf32>,
    %87 = arith.truncf %82 : vector<8x128xf32> to vector<8x128xbf16>
    %c0_45 = arith.constant 0 : index
    %c0_46 = arith.constant 0 : index
    %88 = vector.load %arg12[%c0_45, %c0_46] : memref<128x128xbf16, #tpu.memory_space<vmem>>, vector<128x128xbf16>
    %cst_47 = arith.constant dense<0.000000e+00> : vector<8x128xf32>
    %89 = tpu.matmul %87, %88, %cst_47 {dimension_numbers = #tpu.dot_dimension_numbers<[1], [0], [0], [1], [0, 0, 1, 1], [], []>} : vector<8x128xbf16>, vector<128x128xbf16>, vector<8x128xf32> -> vector<8x128xf32>
    %c0_48 = arith.constant 0 : index
    %c0_49 = arith.constant 0 : index
    %90 = vector.load %arg13[%c0_48, %c0_49] : memref<1x128xf32, #tpu.memory_space<vmem>>, vector<1x128xf32>
    %91 = vector.broadcast %90 : vector<1x128xf32> to vector<8x128xf32>
    %92 = arith.addf %89, %91 : vector<8x128xf32>
    %93 = arith.negf %92 : vector<8x128xf32>
    %94 = math.exp %93 : vector<8x128xf32>
    %cst_50 = arith.constant 1.000000e+00 : f32
    %95 = vector.broadcast %cst_50 : f32 to vector<8x128xf32>
    %96 = arith.addf %95, %94 : vector<8x128xf32>
    %97 = arith.divf %95, %96 : vector<8x128xf32>
    %98 = arith.mulf %92, %97 : vector<8x128xf32>
    %99 = arith.truncf %98 : vector<8x128xf32> to vector<8x128xbf16>
    %c0_51 = arith.constant 0 : index
    %c0_52 = arith.constant 0 : index
    %100 = vector.load %arg14[%c0_51, %c0_52] : memref<128x64xbf16, #tpu.memory_space<vmem>>, vector<128x64xbf16>
    %cst_53 = arith.constant dense<0.000000e+00> : vector<8x64xf32>
    %101 = tpu.matmul %99, %100, %cst_53 {dimension_numbers = #tpu.dot_dimension_numbers<[1], [0], [0], [1], [0, 0, 1, 1], [], []>} : vector<8x128xbf16>, vector<128x64xbf16>, vector<8x64xf32> -> vector<8x64xf32>
    %c0_54 = arith.constant 0 : index
    %c0_55 = arith.constant 0 : index
    %102 = vector.load %arg15[%c0_54, %c0_55] : memref<1x64xf32, #tpu.memory_space<vmem>>, vector<1x64xf32>
    %103 = vector.broadcast %102 : vector<1x64xf32> to vector<8x64xf32>
    %104 = arith.addf %101, %103 : vector<8x64xf32>
    %105 = arith.negf %104 : vector<8x64xf32>
    %106 = math.exp %105 : vector<8x64xf32>
    %cst_56 = arith.constant 1.000000e+00 : f32
    %107 = vector.broadcast %cst_56 : f32 to vector<8x64xf32>
    %108 = arith.addf %107, %106 : vector<8x64xf32>
    %109 = arith.divf %107, %108 : vector<8x64xf32>
    %110 = arith.mulf %104, %109 : vector<8x64xf32>
    %c0_57 = arith.constant 0 : index
    %c0_58 = arith.constant 0 : index
    %111 = vector.load %arg16[%c0_57, %c0_58] : memref<1x64xf32, #tpu.memory_space<vmem>>, vector<1x64xf32>
    %112 = vector.broadcast %111 : vector<1x64xf32> to vector<8x64xf32>
    %113 = arith.mulf %110, %112 : vector<8x64xf32>
    %cst_59 = arith.constant dense<0.000000e+00> : vector<8xf32>
    %114 = vector.multi_reduction <add>, %113, %cst_59 [1] : vector<8x64xf32> to vector<8xf32>
    %115 = vector.shape_cast %114 : vector<8xf32> to vector<8x1xf32>
    %c0_60 = arith.constant 0 : index
    %c0_61 = arith.constant 0 : index
    %116 = vector.load %arg17[%c0_60, %c0_61] : memref<1x1xf32, #tpu.memory_space<vmem>>, vector<1x1xf32>
    %117 = vector.broadcast %116 : vector<1x1xf32> to vector<8x1xf32>
    %118 = arith.addf %115, %117 : vector<8x1xf32>
    %c0_62 = arith.constant 0 : index
    %c0_63 = arith.constant 0 : index
    %c0_64 = arith.constant 0 : index
    %119 = vector.load %arg25[%c0_62, %c0_63, %c0_64] : memref<1x8x1xf32, #tpu.memory_space<vmem>>, vector<1x8x1xf32>
    %120 = vector.shape_cast %119 : vector<1x8x1xf32> to vector<8x1xf32>
    %121 = vector.shape_cast %118 : vector<8x1xf32> to vector<1x8x1xf32>
    tpu.vector_store %arg25[%c0_62, %c0_63, %c0_64], %121 {strides = array<i32>} : memref<1x8x1xf32, #tpu.memory_space<vmem>>, vector<1x8x1xf32>,
    %122 = arith.truncf %83 : vector<64x128xf32> to vector<64x128xbf16>
    %c0_65 = arith.constant 0 : index
    %c0_66 = arith.constant 0 : index
    %123 = vector.load %arg18[%c0_65, %c0_66] : memref<128x128xbf16, #tpu.memory_space<vmem>>, vector<128x128xbf16>
    %cst_67 = arith.constant dense<0.000000e+00> : vector<64x128xf32>
    %124 = tpu.matmul %122, %123, %cst_67 {dimension_numbers = #tpu.dot_dimension_numbers<[1], [0], [0], [1], [0, 0, 1, 1], [], []>} : vector<64x128xbf16>, vector<128x128xbf16>, vector<64x128xf32> -> vector<64x128xf32>
    %c0_68 = arith.constant 0 : index
    %c0_69 = arith.constant 0 : index
    %125 = vector.load %arg19[%c0_68, %c0_69] : memref<1x128xf32, #tpu.memory_space<vmem>>, vector<1x128xf32>
    %126 = vector.broadcast %125 : vector<1x128xf32> to vector<64x128xf32>
    %127 = arith.addf %124, %126 : vector<64x128xf32>
    %128 = arith.negf %127 : vector<64x128xf32>
    %129 = math.exp %128 : vector<64x128xf32>
    %cst_70 = arith.constant 1.000000e+00 : f32
    %130 = vector.broadcast %cst_70 : f32 to vector<64x128xf32>
    %131 = arith.addf %130, %129 : vector<64x128xf32>
    %132 = arith.divf %130, %131 : vector<64x128xf32>
    %133 = arith.mulf %127, %132 : vector<64x128xf32>
    %134 = arith.truncf %133 : vector<64x128xf32> to vector<64x128xbf16>
    %c0_71 = arith.constant 0 : index
    %c0_72 = arith.constant 0 : index
    %135 = vector.load %arg20[%c0_71, %c0_72] : memref<128x64xbf16, #tpu.memory_space<vmem>>, vector<128x64xbf16>
    %cst_73 = arith.constant dense<0.000000e+00> : vector<64x64xf32>
    %136 = tpu.matmul %134, %135, %cst_73 {dimension_numbers = #tpu.dot_dimension_numbers<[1], [0], [0], [1], [0, 0, 1, 1], [], []>} : vector<64x128xbf16>, vector<128x64xbf16>, vector<64x64xf32> -> vector<64x64xf32>
    %c0_74 = arith.constant 0 : index
    %c0_75 = arith.constant 0 : index
    %137 = vector.load %arg21[%c0_74, %c0_75] : memref<1x64xf32, #tpu.memory_space<vmem>>, vector<1x64xf32>
    %138 = vector.broadcast %137 : vector<1x64xf32> to vector<64x64xf32>
    %139 = arith.addf %136, %138 : vector<64x64xf32>
    %140 = arith.negf %139 : vector<64x64xf32>
    %141 = math.exp %140 : vector<64x64xf32>
    %cst_76 = arith.constant 1.000000e+00 : f32
    %142 = vector.broadcast %cst_76 : f32 to vector<64x64xf32>
    %143 = arith.addf %142, %141 : vector<64x64xf32>
    %144 = arith.divf %142, %143 : vector<64x64xf32>
    %145 = arith.mulf %139, %144 : vector<64x64xf32>
    %c0_77 = arith.constant 0 : index
    %c0_78 = arith.constant 0 : index
    %146 = vector.load %arg22[%c0_77, %c0_78] : memref<1x64xf32, #tpu.memory_space<vmem>>, vector<1x64xf32>
    %147 = vector.broadcast %146 : vector<1x64xf32> to vector<64x64xf32>
    %148 = arith.mulf %145, %147 : vector<64x64xf32>
    %cst_79 = arith.constant dense<0.000000e+00> : vector<64xf32>
    %149 = vector.multi_reduction <add>, %148, %cst_79 [1] : vector<64x64xf32> to vector<64xf32>
    %150 = vector.shape_cast %149 : vector<64xf32> to vector<64x1xf32>
    %c0_80 = arith.constant 0 : index
    %c0_81 = arith.constant 0 : index
    %151 = vector.load %arg23[%c0_80, %c0_81] : memref<1x1xf32, #tpu.memory_space<vmem>>, vector<1x1xf32>
    %152 = vector.broadcast %151 : vector<1x1xf32> to vector<64x1xf32>
    %153 = arith.addf %150, %152 : vector<64x1xf32>
    %c0_82 = arith.constant 0 : index
    %c0_83 = arith.constant 0 : index
    %c0_84 = arith.constant 0 : index
    %154 = vector.load %arg26[%c0_82, %c0_83, %c0_84] : memref<1x64x1xf32, #tpu.memory_space<vmem>>, vector<1x64x1xf32>
    %155 = vector.shape_cast %154 : vector<1x64x1xf32> to vector<64x1xf32>
    %156 = vector.shape_cast %153 : vector<64x1xf32> to vector<1x64x1xf32>
    tpu.vector_store %arg26[%c0_82, %c0_83, %c0_84], %156 {strides = array<i32>} : memref<1x64x1xf32, #tpu.memory_space<vmem>>, vector<1x64x1xf32>,
    return
  }
  func.func @transform_0(%arg0: i32) -> (i32, i32, i32) {
    %c0_i32 = arith.constant 0 : i32
    %c0_i32_0 = arith.constant 0 : i32
    %c0_i32_1 = arith.constant 0 : i32
    return %arg0, %c0_i32, %c0_i32_0 : i32, i32, i32
  }
  func.func @transform_1(%arg0: i32) -> (i32, i32, i32) {
    %c0_i32 = arith.constant 0 : i32
    %c0_i32_0 = arith.constant 0 : i32
    %c0_i32_1 = arith.constant 0 : i32
    return %arg0, %c0_i32, %c0_i32_0 : i32, i32, i32
  }
  func.func @transform_2(%arg0: i32) -> (i32, i32, i32) {
    %c0_i32 = arith.constant 0 : i32
    %c0_i32_0 = arith.constant 0 : i32
    %c0_i32_1 = arith.constant 0 : i32
    return %arg0, %c0_i32, %c0_i32_0 : i32, i32, i32
  }
  func.func @transform_3(%arg0: i32) -> (i32, i32, i32) {
    %c0_i32 = arith.constant 0 : i32
    %c0_i32_0 = arith.constant 0 : i32
    %c0_i32_1 = arith.constant 0 : i32
    return %arg0, %c0_i32, %c0_i32_0 : i32, i32, i32
  }
  func.func @transform_4(%arg0: i32) -> (i32, i32, i32) {
    %c0_i32 = arith.constant 0 : i32
    %c0_i32_0 = arith.constant 0 : i32
    %c0_i32_1 = arith.constant 0 : i32
    return %arg0, %c0_i32, %c0_i32_0 : i32, i32, i32
  }
  func.func @transform_5(%arg0: i32) -> (i32, i32) {
    %c0_i32 = arith.constant 0 : i32
    %c0_i32_0 = arith.constant 0 : i32
    %c0_i32_1 = arith.constant 0 : i32
    return %c0_i32, %c0_i32_0 : i32, i32
  }
  func.func @transform_6(%arg0: i32) -> (i32, i32) {
    %c0_i32 = arith.constant 0 : i32
    %c0_i32_0 = arith.constant 0 : i32
    %c0_i32_1 = arith.constant 0 : i32
    return %c0_i32, %c0_i32_0 : i32, i32
  }
  func.func @transform_7(%arg0: i32) -> (i32, i32) {
    %c0_i32 = arith.constant 0 : i32
    %c0_i32_0 = arith.constant 0 : i32
    %c0_i32_1 = arith.constant 0 : i32
    return %c0_i32, %c0_i32_0 : i32, i32
  }
  func.func @transform_8(%arg0: i32) -> (i32, i32) {
    %c0_i32 = arith.constant 0 : i32
    %c0_i32_0 = arith.constant 0 : i32
    %c0_i32_1 = arith.constant 0 : i32
    return %c0_i32, %c0_i32_0 : i32, i32
  }
  func.func @transform_9(%arg0: i32) -> (i32, i32) {
    %c0_i32 = arith.constant 0 : i32
    %c0_i32_0 = arith.constant 0 : i32
    %c0_i32_1 = arith.constant 0 : i32
    return %c0_i32, %c0_i32_0 : i32, i32
  }
  func.func @transform_10(%arg0: i32) -> (i32, i32) {
    %c0_i32 = arith.constant 0 : i32
    %c0_i32_0 = arith.constant 0 : i32
    %c0_i32_1 = arith.constant 0 : i32
    return %c0_i32, %c0_i32_0 : i32, i32
  }
  func.func @transform_11(%arg0: i32) -> (i32, i32) {
    %c0_i32 = arith.constant 0 : i32
    %c0_i32_0 = arith.constant 0 : i32
    %c0_i32_1 = arith.constant 0 : i32
    return %c0_i32, %c0_i32_0 : i32, i32
  }
  func.func @transform_12(%arg0: i32) -> (i32, i32) {
    %c0_i32 = arith.constant 0 : i32
    %c0_i32_0 = arith.constant 0 : i32
    %c0_i32_1 = arith.constant 0 : i32
    return %c0_i32, %c0_i32_0 : i32, i32
  }
  func.func @transform_13(%arg0: i32) -> (i32, i32) {
    %c0_i32 = arith.constant 0 : i32
    %c0_i32_0 = arith.constant 0 : i32
    %c0_i32_1 = arith.constant 0 : i32
    return %c0_i32, %c0_i32_0 : i32, i32
  }
  func.func @transform_14(%arg0: i32) -> (i32, i32) {
    %c0_i32 = arith.constant 0 : i32
    %c0_i32_0 = arith.constant 0 : i32
    %c0_i32_1 = arith.constant 0 : i32
    return %c0_i32, %c0_i32_0 : i32, i32
  }
  func.func @transform_15(%arg0: i32) -> (i32, i32) {
    %c0_i32 = arith.constant 0 : i32
    %c0_i32_0 = arith.constant 0 : i32
    %c0_i32_1 = arith.constant 0 : i32
    return %c0_i32, %c0_i32_0 : i32, i32
  }
  func.func @transform_16(%arg0: i32) -> (i32, i32) {
    %c0_i32 = arith.constant 0 : i32
    %c0_i32_0 = arith.constant 0 : i32
    %c0_i32_1 = arith.constant 0 : i32
    return %c0_i32, %c0_i32_0 : i32, i32
  }
  func.func @transform_17(%arg0: i32) -> (i32, i32) {
    %c0_i32 = arith.constant 0 : i32
    %c0_i32_0 = arith.constant 0 : i32
    %c0_i32_1 = arith.constant 0 : i32
    return %c0_i32, %c0_i32_0 : i32, i32
  }
  func.func @transform_18(%arg0: i32) -> (i32, i32) {
    %c0_i32 = arith.constant 0 : i32
    %c0_i32_0 = arith.constant 0 : i32
    %c0_i32_1 = arith.constant 0 : i32
    return %c0_i32, %c0_i32_0 : i32, i32
  }
  func.func @transform_19(%arg0: i32) -> (i32, i32) {
    %c0_i32 = arith.constant 0 : i32
    %c0_i32_0 = arith.constant 0 : i32
    %c0_i32_1 = arith.constant 0 : i32
    return %c0_i32, %c0_i32_0 : i32, i32
  }
  func.func @transform_20(%arg0: i32) -> (i32, i32) {
    %c0_i32 = arith.constant 0 : i32
    %c0_i32_0 = arith.constant 0 : i32
    %c0_i32_1 = arith.constant 0 : i32
    return %c0_i32, %c0_i32_0 : i32, i32
  }
  func.func @transform_21(%arg0: i32) -> (i32, i32) {
    %c0_i32 = arith.constant 0 : i32
    %c0_i32_0 = arith.constant 0 : i32
    %c0_i32_1 = arith.constant 0 : i32
    return %c0_i32, %c0_i32_0 : i32, i32
  }
  func.func @transform_22(%arg0: i32) -> (i32, i32) {
    %c0_i32 = arith.constant 0 : i32
    %c0_i32_0 = arith.constant 0 : i32
    %c0_i32_1 = arith.constant 0 : i32
    return %c0_i32, %c0_i32_0 : i32, i32
  }
  func.func @transform_23(%arg0: i32) -> (i32, i32, i32) {
    %c0_i32 = arith.constant 0 : i32
    %c0_i32_0 = arith.constant 0 : i32
    %c0_i32_1 = arith.constant 0 : i32
    return %arg0, %c0_i32, %c0_i32_0 : i32, i32, i32
  }
  func.func @transform_24(%arg0: i32) -> (i32, i32, i32) {
    %c0_i32 = arith.constant 0 : i32
    %c0_i32_0 = arith.constant 0 : i32
    %c0_i32_1 = arith.constant 0 : i32
    return %arg0, %c0_i32, %c0_i32_0 : i32, i32, i32
  }
  func.func @transform_25(%arg0: i32) -> (i32, i32, i32) {
    %c0_i32 = arith.constant 0 : i32
    %c0_i32_0 = arith.constant 0 : i32
    %c0_i32_1 = arith.constant 0 : i32
    return %arg0, %c0_i32, %c0_i32_0 : i32, i32, i32
  }
}

</mosaic_0001>

<bundles_post_ra>
// kernel: tpu_custom_call.1
= control target key start
LH: loop header
LB: loop body
LE: loop exit
PB: predicated region body
PF: predicated region fallthrough
CT: control target
= control target key end

     0   :  { %s4279_s0 = inlined_call_operand.vmem [shape: bf16[2,8,128], index: 0, kind: input, shape index: {}]   ;;  %s4280_s1 = inlined_call_operand.vmem [shape: bf16[2,64,20], index: 1, kind: input, shape index: {}]   ;;  %s4281_s2 = inlined_call_operand.vmem [shape: f32[2,64,1], index: 2, kind: input, shape index: {}]   ;;  %s4282_s3 = inlined_call_operand.vmem [shape: f32[2,64,1], index: 3, kind: input, shape index: {}]   ;;  %s4283_s4 = inlined_call_operand.vmem [shape: s32[2,64,1], index: 4, kind: input, shape index: {}]   ;;  %s4284_s5 = inlined_call_operand.vmem [shape: bf16[20,128], index: 5, kind: input, shape index: {}]   ;;  %s4285_s6 = inlined_call_operand.vmem [shape: f32[1,128], index: 6, kind: input, shape index: {}]   ;;  %s4286_s7 = inlined_call_operand.vmem [shape: bf16[128,128], index: 7, kind: input, shape index: {}]   ;;  %s4287_s8 = inlined_call_operand.vmem [shape: f32[1,128], index: 8, kind: input, shape index: {}]   ;;  %s4288_s9 = inlined_call_operand.vmem [shape: bf16[128,128], index: 9, kind: input, shape index: {}]   ;;  %s4289_s10 = inlined_call_operand.vmem [shape: f32[1,128], index: 10, kind: input, shape index: {}]   ;;  %s4290_s11 = inlined_call_operand.vmem [shape: bf16[128,128], index: 11, kind: input, shape index: {}]   ;;  %s4291_s12 = inlined_call_operand.vmem [shape: f32[1,128], index: 12, kind: input, shape index: {}]   ;;  %s4292_s13 = inlined_call_operand.vmem [shape: bf16[128,64], index: 13, kind: input, shape index: {}]   ;;  %s4293_s14 = inlined_call_operand.vmem [shape: f32[1,64], index: 14, kind: input, shape index: {}]   ;;  %s4294_s15 = inlined_call_operand.vmem [shape: f32[1,64], index: 15, kind: input, shape index: {}]   ;;  %s4295_s16 = inlined_call_operand.<no memory space> [shape: f32[1,1], index: 16, kind: input, shape index: {}]   ;;  %s4296_s17 = inlined_call_operand.vmem [shape: bf16[128,128], index: 17, kind: input, shape index: {}]   ;;  %s4297_s18 = inlined_call_operand.vmem [shape: f32[1,128], index: 18, kind: input, shape index: {}]   ;;  %s4298_s19 = inlined_call_operand.vmem [shape: bf16[128,64], index: 19, kind: input, shape index: {}]   ;;  %s4299_s20 = inlined_call_operand.vmem [shape: f32[1,64], index: 20, kind: input, shape index: {}]   ;;  %s4300_s21 = inlined_call_operand.vmem [shape: f32[1,64], index: 21, kind: input, shape index: {}]   ;;  %s4301_s23 = inlined_call_operand.hbm [shape: f32[2,8,128], index: 23, kind: output, shape index: {0}]   ;;  %s4302_s24 = inlined_call_operand.vmem [shape: f32[2,8,1], index: 24, kind: output, shape index: {1}]   ;;  %s4303_s25 = inlined_call_operand.vmem [shape: f32[2,64,1], index: 25, kind: output, shape index: {2}]   ;;  %s4304_s22 = inlined_call_operand.<no memory space> [shape: f32[1,1], index: 22, kind: input, shape index: {}]  }
   0x1   :  { %4315 = sst [smem:[#allocation10_spill]] %s4279_s0  ;;  %v31_v0 = vstv %s4295_s16  ;;  %v33_v1 = vstv %s4304_s22 }
   0x2   :  { %4316 = sst [smem:[#allocation11_spill]] %s4280_s1  ;;  %32 = vst [vmem:[#allocation2] sm:$0x1] %v31_v0  ;;  %34 = vst [vmem:[#allocation3] sm:$0x1] %v33_v1 }
   0x3   :  { %4317 = sst [smem:[#allocation12_spill]] %s4281_s2 }
   0x4   :  { %4318 = sst [smem:[#allocation13_spill]] %s4282_s3 }
   0x5   :  { %4319 = sst [smem:[#allocation14_spill]] %s4283_s4 }
   0x6   :  { %4320 = sst [smem:[#allocation15_spill]] %s4284_s5 }
   0x7   :  { %4321 = sst [smem:[#allocation16_spill]] %s4285_s6 }
   0x8   :  { %4322 = sst [smem:[#allocation17_spill]] %s4286_s7 }
   0x9   :  { %4323 = sst [smem:[#allocation18_spill]] %s4287_s8 }
   0xa   :  { %4324 = sst [smem:[#allocation19_spill]] %s4288_s9 }
   0xb   :  { %4325 = sst [smem:[#allocation20_spill]] %s4289_s10 }
   0xc   :  { %4326 = sst [smem:[#allocation21_spill]] %s4290_s11 }
   0xd   :  { %4327 = sst [smem:[#allocation22_spill]] %s4291_s12 }
   0xe   :  { %4328 = sst [smem:[#allocation23_spill]] %s4292_s13 }
   0xf   :  { %4329 = sst [smem:[#allocation24_spill]] %s4293_s14 }
  0x10   :  { %35 = vsyncpa [#allocation5], 0 }
  0x11   :  { %37 = vsyncpa [#allocation5 + $0x1], 0  ;;  %s3590_s7 = smov 0   ;;  %s3592_s3 = smov 0  }
  0x12   :  { %s3594_s26 = smov 0   ;;  %s3596_s1 = smov 0  }
  0x13 LB: > { %4330 = sst [smem:[#allocation7_spill]] %s3443_s26  ;;  %s3611_s16 = sadd.s32 4294967295, %s3447_s1   ;;  %s3447_s1 = sphi %s3596_s1, %s4352_s1   ;;  %s3443_s26 = sphi %s3594_s26, %s4354_s26   ;;  %s3439_s3 = sphi %s3592_s3, %s4356_s3   ;;  %s3435_s7 = sphi %s3590_s7, %s4355_s7  }
  0x14   : > { %s2849_s22 = sadd.s32 4294967294, %s3447_s1   ;;  %s3615_s8 = sadd.s32 1, %s3447_s1  }
  0x15   : > { %4331 = sst [smem:[#allocation8_spill]] %s3615_s8  ;;  %s558_s27 = sadd.s32 1, %s3443_s26 }
  0x16   : > { %s555_s4 = ssub.s32 %s3447_s1, %s3615_s8  ;;  %p568_p0 = scmp.ne.s32.totalorder %s3443_s26, %s3439_s3 }
  0x17   : > { %p556_p1 = scmp.eq.s32.totalorder %s555_s4, 0  ;;  %p569_p2 = scmp.eq.s32.totalorder %s3611_s16, 1 }
  0x18   : > { %p574_p3 = scmp.ne.s32.totalorder %s3439_s3, %s3435_s7  ;;  %p575_p4 = scmp.eq.s32.totalorder %s2849_s22, 1 }
  0x19   : > { %s3626_s28 = scalar_select %p556_p1, %s3443_s26, %s558_s27  }
  0x1a   : > { %p3628_p5 = por %p569_p2, %p568_p0  ;;  %p3632_p6 = por %p575_p4, %p574_p3 }
  0x1b   : > { %4332 = sst [smem:[#allocation9_spill]] %s3626_s28  ;;  %p2852_p7 = scmp.ge.s32.totalorder %s3447_s1, 1 }
  0x1c   : > { %p738_p8 = scmp.lt.s32.totalorder %s3447_s1, 3 }
  0x1e   : > { %p739_p9 = pnand %p2852_p7, %p738_p8 }
  0x1f   : > { %s4335_s2 = sld [smem:[#allocation15_spill]] (!%p739_p9)  ;;  %v3449_v3 = vmov (!%p739_p9), 0   ;;  %vm1164_vm0 = vcmask (!%p739_p9), 1041408   ;;  %p834_p10 = scmp.lt.s32.totalorder (!%p739_p9), %s3611_s16, 1  ;;  %vm1151_vm1 = vcmask (!%p739_p9), 162816   ;;  %v3450_v9 = vmov (!%p739_p9), 0.0  }
  0x20   : > { %742 = sbr.rel (%p739_p9) target bundleno = 1614 (0x64e), region = 112  ;;  %3254 = vset.pattern.permute.xlu1 (!%p739_p9), %v3449_v3  ;;  %3253 = vset.pattern.permute.xlu0 (!%p739_p9), %v3449_v3  ;;  %s4336_s28 = sld [smem:[#allocation14_spill]] (!%p739_p9)  ;;  %vm1027_vm2 = vcmask (!%p739_p9), 1043456   ;;  %vm3451_vm11 = vmmov (!%p739_p9), 0  }
  0x21   : > { %s4337_s26 = sld [smem:[#allocation11_spill]] (!%p739_p9)  ;;  %s4341_s30 = sld [smem:[#allocation17_spill]] (!%p739_p9) }
  0x22   : > { %s4344_s10 = sld [smem:[#allocation20_spill]] (!%p739_p9)  ;;  %s4345_s11 = sld [smem:[#allocation21_spill]] (!%p739_p9) }
  0x23   : > { %s4347_s13 = sld [smem:[#allocation23_spill]] (!%p739_p9)  ;;  %s4348_s12 = sld [smem:[#allocation22_spill]] (!%p739_p9) }
  0x24   : > { %s4349_s14 = sld [smem:[#allocation24_spill]] (!%p739_p9) }
  0x25   : > { %v3255_v2 = vld [vmem:[%s4335_s2] sm:$0xff] (!%p739_p9)   ;;  %v3256_v4 = vld [vmem:[%s4335_s2 + $0x8] ss:$0 sps:$4 sm:$0x33] (!%p739_p9)   ;;  %s4338_s2 = sld [smem:[#allocation12_spill]] (!%p739_p9) }
  0x26   : > { %3057 = vmatprep.subr.bf16.mxu1 (!%p739_p9), %v3255_v2  ;;  %v1166_v5 = vsel (!%p739_p9), %vm1164_vm0, %v3256_v4, 0 }
  0x27   : > { %3058 = vmatpush3.bf16.msra.mxu1 %v3255_v2  ;;  %s3646_s22 = scalar_select %p834_p10, %s3611_s16, 1 }
  0x28   : > { %3208 = vmatprep.subr.msk.bf16.mxu1 %vm1164_vm0, %v3256_v4  ;;  %vm1014_vm0 = vcmask 64512  }
  0x29   : > { %s3649_s27 = sshll.u32 %s3646_s22, 6  ;;  %s2966_s4 = sshll.u32 %s3646_s22, 5 }
  0x2a   : > { %s3656_s6 = scalar_lea.vmem %s4336_s28, %s3649_s27  ;;  %s3663_s8 = scalar_lea.vmem %s4337_s26, %s2966_s4 }
  0x2b   : > { %3060 = vmatpush3.bf16.msra.mxu1 %v1166_v5  ;;  %v873_v6 = vld [vmem:[%s3656_s6 + $0x10] sm:$0xff]  ;;  %v871_v7 = vld [vmem:[%s3656_s6] sm:$0xff]  ;;  %v874_v8 = vld [vmem:[%s3656_s6 + $0x18] sm:$0xff]  ;;  %s3673_s29 = scalar_lea.vmem %s4338_s2, %s3649_s27  ;;  %s2854_s26 = sshll.u32 %s3646_s22, 2 }
  0x2c   : > { %3089 = vmatprep.subr.bf16.mxu1 %v3450_v9  ;;  %886 = vperm.xlu1 %3254, %v873_v6   ;;  %v3257_v10 = vld [vmem:[%s3663_s8] sm:$0xff]   ;;  %v872_v11 = vld [vmem:[%s3656_s6 + $0x8] sm:$0xff]  ;;  %v3259_v13 = vld [vmem:[%s3663_s8 + $0x10] sm:$0xff]   ;;  %s4339_s28 = sld [smem:[#allocation10_spill]]  ;;  %s4340_s2 = sld [smem:[#allocation13_spill]] }
  0x2d   : > { %880 = vperm.xlu0 %3253, %v871_v7   ;;  %3061 = vmatprep.mubr.msk.bf16.mxu1 %vm1151_vm1, %v3257_v10  ;;  %v3258_v12 = vld [vmem:[%s3663_s8 + $0x8] sm:$0xff]   ;;  %v875_v15 = vld [vmem:[%s3656_s6 + $0x20] sm:$0xff]  ;;  %v1236_v20 = vld [vmem:[%s3673_s29 + $0x18] sm:$0xff]  ;;  %s4346_s4 = sld [smem:[#allocation16_spill]] }
  0x2e   : > { %v876_v14 = vld [vmem:[%s3656_s6 + $0x28] sm:$0xff]  ;;  %3062 = vmatmul.mubr.msk.bf16.vlgmr.msra.gmra.mrb[0].mxu1 %vm1151_vm1, %v3258_v12  ;;  %v1233_v18 = vld [vmem:[%s3673_s29] sm:$0xff]  ;;  %v1235_v21 = vld [vmem:[%s3673_s29 + $0x10] sm:$0xff]  ;;  %v3695_v25 = vmul.f32 0.2, %v1236_v20 }
  0x2f   : > { %v1234_v16 = vld [vmem:[%s3673_s29 + $0x8] sm:$0xff]  ;;  %3065 = vmatprep.mubr.msk.bf16.mxu1 %vm1151_vm1, %v3259_v13  ;;  %v3687_v19 = vmul.f32 0.2, %v1233_v18  ;;  %v878_v22 = vld [vmem:[%s3656_s6 + $0x38] sm:$0xff]  ;;  %v877_v23 = vld [vmem:[%s3656_s6 + $0x30] sm:$0xff] }
  0x30   : > { %889 = vperm.xlu1 %3254, %v874_v8   ;;  %v3683_v17 = vmul.f32 0.2, %v1234_v16  ;;  %v3697_v26 = vmul.f32 0.2, %v1235_v21  ;;  %v3260_v27 = vld [vmem:[%s3663_s8 + $0x18] sm:$0xff]   ;;  %v1238_v29 = vld [vmem:[%s3673_s29 + $0x28] sm:$0xff]  ;;  %v1252_v32 = vmul.f32 %v3695_v25, %v3695_v25 }
  0x31   : > { %883 = vperm.xlu0 %3253, %v872_v11   ;;  %v1249_v28 = vmul.f32 %v3687_v19, %v3687_v19  ;;  %v1237_v30 = vld [vmem:[%s3673_s29 + $0x20] sm:$0xff]  ;;  %v1240_v34 = vld [vmem:[%s3673_s29 + $0x38] sm:$0xff]  ;;  %v3712_v36 = vmul.f32 0.2, %v1238_v29  ;;  %vm1345_vm4 = vcmp.lt.f32.partialorder %v3687_v19, 1.0  ;;  %vm1348_vm5 = vcmp.lt.f32.partialorder %v3695_v25, 1.0 }
  0x32   : > { %v1250_v24 = vmul.f32 %v3683_v17, %v3683_v17  ;;  %s837_s0 = scalar_lea.vmem %s4339_s28, %s2854_s26  ;;  %v1251_v33 = vmul.f32 %v3697_v26, %v3697_v26  ;;  %v3714_v37 = vmul.f32 0.2, %v1237_v30  ;;  %v1260_v39 = vmul.f32 %v1252_v32, %v1252_v32  ;;  %s3741_s26 = scalar_lea.vmem %s4340_s2, %s3649_s27 }
  0x33   : > { %v1257_v35 = vmul.f32 %v1249_v28, %v1249_v28  ;;  %v3716_v41 = vmul.f32 0.2, %v1240_v34  ;;  %v3718_v42 = vld [vmem:[%s837_s0] sm:$0xf]  ;;  %vm1346_vm3 = vcmp.lt.f32.partialorder %v3683_v17, 1.0  ;;  %v1254_v44 = vmul.f32 %v3712_v36, %v3712_v36  ;;  %v1362_v7 = vld [vmem:[%s3741_s26 + $0x8] sm:$0xff] }
  0x34   : > { %895 = vperm.xlu1 %3254, %v876_v14   ;;  %v1258_v31 = vmul.f32 %v1250_v24, %v1250_v24  ;;  %v1259_v40 = vmul.f32 %v1251_v33, %v1251_v33  ;;  %v1253_v45 = vmul.f32 %v3714_v37, %v3714_v37  ;;  %3207 = vmatprep.subr.msk.bf16.mxu0 %vm1027_vm2, %v3718_v42  ;;  %vm1347_vm6 = vcmp.lt.f32.partialorder %v3697_v26, 1.0  ;;  %v1364_v29 = vld [vmem:[%s3741_s26 + $0x18] sm:$0xff]  ;;  %s4342_s28 = sld [smem:[#allocation19_spill]]  ;;  %s4343_s0 = sld [smem:[#allocation18_spill]] }
  0x35   : > { %892 = vperm.xlu0 %3253, %v875_v15   ;;  %v1265_v43 = vmul.f32 %v1257_v35, %v1257_v35  ;;  %v1268_v47 = vmul.f32 %v1260_v39, %v1260_v39  ;;  %v1262_v50 = vmul.f32 %v1254_v44, %v1254_v44  ;;  %v1256_v52 = vmul.f32 %v3716_v41, %v3716_v41  ;;  %s4351_s2 = sand.u32 1, %s3439_s3  }
  0x36   : > { %v1266_v38 = vmul.f32 %v1258_v31, %v1258_v31  ;;  %3066 = vmatmul.mubr.msk.bf16.gmra.mrb[4].mxu1 %vm1151_vm1, %v3260_v27  ;;  %v1267_v48 = vmul.f32 %v1259_v40, %v1259_v40  ;;  %v1261_v51 = vmul.f32 %v1253_v45, %v1253_v45  ;;  %v1363_v45 = vld [vmem:[%s3741_s26 + $0x10] sm:$0xff]  ;;  %vm1350_vm7 = vcmp.lt.f32.partialorder %v3712_v36, 1.0 }
  0x37   : > { %v1273_v49 = vmul.f32 %v1265_v43, %v3687_v19  ;;  %v1276_v55 = vmul.f32 %v1268_v47, %v3695_v25  ;;  %v1270_v59 = vmul.f32 %v1262_v50, %v1262_v50  ;;  %vm1349_vm8 = vcmp.lt.f32.partialorder %v3714_v37, 1.0  ;;  %3105 = vmatprep.mubr.msk.bf16.mxu1 %vm3451_vm11, %v3450_v9 }
  0x38   : > { %901 = vperm.xlu1 %3254, %v878_v22   ;;  %v1274_v46 = vmul.f32 %v1266_v38, %v3683_v17  ;;  %v1275_v56 = vmul.f32 %v1267_v48, %v3697_v26  ;;  %v1269_v60 = vmul.f32 %v1261_v51, %v1261_v51  ;;  %v1361_v22 = vld [vmem:[%s3741_s26] sm:$0xff]  ;;  %v1264_v48 = vmul.f32 %v1256_v52, %v1256_v52 }
  0x39   : > { %898 = vperm.xlu0 %3253, %v877_v23   ;;  %v1281_v57 = vmul.f32 %v1273_v49, %v3687_v19  ;;  %v1297_v58 = vmul.f32 55.0, %v1273_v49  ;;  %v1284_v0 = vmul.f32 %v1276_v55, %v3695_v25  ;;  %v1300_v4 = vmul.f32 55.0, %v1276_v55  ;;  %v1239_v49 = vld [vmem:[%s3673_s29 + $0x30] sm:$0xff] }
  0x3a   : > { %v1282_v53 = vmul.f32 %v1274_v46, %v3683_v17  ;;  %v1298_v54 = vmul.f32 55.0, %v1274_v46  ;;  %v1283_v14 = vmul.f32 %v1275_v56, %v3697_v26  ;;  %v1299_v18 = vmul.f32 55.0, %v1275_v56 }
  0x3b   : > { %v1289_v1 = vmul.f32 %v1281_v57, %v3687_v19  ;;  %v1305_v2 = vsub.f32 1.0, %v1297_v58  ;;  %v1313_v3 = vmul.f32 99.0, %v1281_v57  ;;  %v1292_v8 = vmul.f32 %v1284_v0, %v3695_v25 }
  0x3c   : > { %v1290_v61 = vmul.f32 %v1282_v53, %v3683_v17  ;;  %v1306_v62 = vsub.f32 1.0, %v1298_v54  ;;  %v1314_v63 = vmul.f32 99.0, %v1282_v53  ;;  %v1316_v10 = vmul.f32 99.0, %v1284_v0 }
  0x3d   : > { %v1321_v11 = vadd.f32 %v1313_v3, %v1305_v2  ;;  %v1329_v12 = vmul.f32 45.0, %v1289_v1  ;;  %v1308_v13 = vsub.f32 1.0, %v1300_v4  ;;  %v1332_v16 = vmul.f32 45.0, %v1292_v8 }
  0x3e   : > { %v1322_v5 = vadd.f32 %v1314_v63, %v1306_v62  ;;  %v1330_v6 = vmul.f32 45.0, %v1290_v61  ;;  %v1278_v20 = vmul.f32 %v1270_v59, %v3712_v36  ;;  %v1291_v24 = vmul.f32 %v1283_v14, %v3697_v26 }
  0x3f   : > { %v1337_v21 = vsub.f32 %v1321_v11, %v1329_v12  ;;  %v1324_v23 = vadd.f32 %v1316_v10, %v1308_v13  ;;  %v1315_v27 = vmul.f32 99.0, %v1283_v14  ;;  %v1307_v30 = vsub.f32 1.0, %v1299_v18 }
  0x40   : > { %v1338_v15 = vsub.f32 %v1322_v5, %v1330_v6  ;;  %v1286_v31 = vmul.f32 %v1278_v20, %v3712_v36  ;;  %v1302_v32 = vmul.f32 55.0, %v1278_v20  ;;  %v1331_v38 = vmul.f32 45.0, %v1291_v24  ;;  %v1365_v5 = vld [vmem:[%s3741_s26 + $0x20] sm:$0xff] }
  0x41   : > { %v1353_v34 = vsel %vm1345_vm4, %v1337_v21, 0.0  ;;  %v1340_v35 = vsub.f32 %v1324_v23, %v1332_v16  ;;  %v1323_v40 = vadd.f32 %v1315_v27, %v1307_v30  ;;  %v1277_v47 = vmul.f32 %v1269_v60, %v3714_v37  ;;  %v1366_v60 = vld [vmem:[%s3741_s26 + $0x28] sm:$0xff]  ;;  %v1368_v21 = vld [vmem:[%s3741_s26 + $0x38] sm:$0xff] }
  0x42   : > { %v1354_v28 = vsel %vm1346_vm3, %v1338_v15, 0.0  ;;  %v1369_v39 = vmul.f32 %v1361_v22, %v1353_v34  ;;  %v1294_v43 = vmul.f32 %v1286_v31, %v3712_v36  ;;  %v1310_v44 = vsub.f32 1.0, %v1302_v32 }
  0x43   : > { %v1370_v33 = vmul.f32 %v1362_v7, %v1354_v28  ;;  %v1356_v17 = vsel %vm1348_vm5, %v1340_v35, 0.0  ;;  %v1318_v46 = vmul.f32 99.0, %v1286_v31  ;;  %v1339_v50 = vsub.f32 %v1323_v40, %v1331_v38 }
  0x44   : > { %1379 = vperm.xlu0 %3253, %v1369_v39   ;;  %v1372_v19 = vmul.f32 %v1364_v29, %v1356_v17  ;;  %v1334_v51 = vmul.f32 45.0, %v1294_v43  ;;  %v1285_v54 = vmul.f32 %v1277_v47, %v3714_v37  ;;  %v1301_v55 = vmul.f32 55.0, %v1277_v47 }
  0x45   : > { %1384 = vperm.xlu1 %3254, %v1370_v33   ;;  %v1326_v53 = vadd.f32 %v1318_v46, %v1310_v44  ;;  %v1272_v56 = vmul.f32 %v1264_v48, %v1264_v48  ;;  %v1355_v25 = vsel %vm1347_vm6, %v1339_v50, 0.0  ;;  %v1247_v57 = vmul.f32 0.2, %v1239_v49  ;;  %v1367_v33 = vld [vmem:[%s3741_s26 + $0x30] sm:$0xff]  ;;  %v3261_v50 = vld [vmem:[%s4341_s30] sm:$0xff]   ;;  %s2665_s26 = scalar_lea.sflag [#allocation5], %s4351_s2 }
  0x46   : > { %v1029_v52 = vsel %vm1027_vm2, %v3718_v42, 0  ;;  %v1371_v58 = vmul.f32 %v1363_v45, %v1355_v25  ;;  %v1293_v61 = vmul.f32 %v1285_v54, %v3714_v37  ;;  %v1309_v62 = vsub.f32 1.0, %v1301_v55  ;;  %v3262_v25 = vld [vmem:[%s4341_s30 + $0x8] sm:$0xff]  }
  0x47   : > { %v1342_v59 = vsub.f32 %v1326_v53, %v1334_v51  ;;  %3048 = vmatpush3.bf16.msra.mxu0 %v1029_v52  ;;  %v1317_v63 = vmul.f32 99.0, %v1285_v54  ;;  %v1280_v0 = vmul.f32 %v1272_v56, %v3716_v41  ;;  %v1255_v1 = vmul.f32 %v1247_v57, %v1247_v57 }
  0x48   : > { %3069 = vmatprep.subr.bf16.mxu0 %v3450_v9  ;;  %1389 = vperm.xlu0 %3253, %v1371_v58   ;;  %v1333_v2 = vmul.f32 45.0, %v1293_v61  ;;  %vm1352_vm9 = vcmp.lt.f32.partialorder %v3716_v41, 1.0  ;;  %vm1351_vm10 = vcmp.lt.f32.partialorder %v1247_v57, 1.0  ;;  %v869_v39 = vlaneseq  ;;  %v3263_v61 = vld [vmem:[%s4341_s30 + $0x10] sm:$0xff]  }
  0x49   : > { %1394 = vperm.xlu1 %3254, %v1372_v19   ;;  %v1358_v26 = vsel %vm1350_vm7, %v1342_v59, 0.0  ;;  %v1325_v4 = vadd.f32 %v1317_v63, %v1309_v62  ;;  %v1288_v6 = vmul.f32 %v1280_v0, %v3716_v41  ;;  %v1304_v7 = vmul.f32 55.0, %v1280_v0  ;;  %v3264_v62 = vld [vmem:[%s4341_s30 + $0x18] sm:$0xff]   ;;  %v3265_v63 = vld [vmem:[%s4341_s30 + $0x20] sm:$0xff]   ;;  %v3266_v0 = vld [vmem:[%s4341_s30 + $0x28] sm:$0xff]  }
  0x4a   : > { %v1374_v3 = vmul.f32 %v1366_v60, %v1358_v26  ;;  %v1263_v8 = vmul.f32 %v1255_v1, %v1255_v1  ;;  %v3267_v1 = vld [vmem:[%s4341_s30 + $0x30] sm:$0xff]   ;;  %v3268_v26 = vld [vmem:[%s4341_s30 + $0x38] sm:$0xff]   ;;  %vm1904_vm6 = vcmask 1042434   ;;  %vm1906_vm7 = vcmask 1043459   ;;  %s2963_s30 = sshll.u32 %s3611_s16, 7 }
  0x4b   : > { %v1341_v10 = vsub.f32 %v1325_v4, %v1333_v2  ;;  %v1296_v11 = vmul.f32 %v1288_v6, %v3716_v41  ;;  %v1312_v12 = vsub.f32 1.0, %v1304_v7  ;;  %v1320_v36 = vmul.f32 99.0, %v1288_v6 }
  0x4c   : > { %v1271_v13 = vmul.f32 %v1263_v8, %v1263_v8  ;;  %v870_v41 = vand.u32 127, %v869_v39 }
  0x4d   : > { %1404 = vperm.xlu1 %3254, %v1374_v3   ;;  %v1357_v14 = vsel %vm1349_vm8, %v1341_v10, 0.0  ;;  %v1328_v15 = vadd.f32 %v1320_v36, %v1312_v12  ;;  %v1336_v37 = vmul.f32 45.0, %v1296_v11  ;;  %v3269_v11 = vld [vmem:[%s4342_s28] sm:$0xff]   ;;  %v3270_v12 = vld [vmem:[%s4342_s28 + $0x8] sm:$0xff]   ;;  %v3271_v36 = vld [vmem:[%s4342_s28 + $0x10] sm:$0xff]   ;;  %vm1908_vm8 = vcmask 1044484  }
  0x4e   : > { %v1373_v16 = vmul.f32 %v1365_v5, %v1357_v14  ;;  %v1279_v18 = vmul.f32 %v1271_v13, %v1247_v57  ;;  %3090 = vmatpush3.bf16.msra.mxu1 %v3269_v11  ;;  %v3272_v13 = vld [vmem:[%s4342_s28 + $0x18] sm:$0xff]   ;;  %v3273_v14 = vld [vmem:[%s4342_s28 + $0x20] sm:$0xff]  }
  0x4f   : > { %v1344_v20 = vsub.f32 %v1328_v15, %v1336_v37  ;;  %3091 = vmatprep.subr.bf16.mxu1 %v3450_v9  ;;  %v3274_v15 = vld [vmem:[%s4342_s28 + $0x28] sm:$0xff]   ;;  %v3275_v37 = vld [vmem:[%s4342_s28 + $0x30] sm:$0xff]   ;;  %v2881_v11 = vld [vmem:[%s4343_s0] ss:$0 sm:$0xff]  ;;  %s4313_s0 = sand.u32 1, %s3439_s3  }
  0x50   : > { %1399 = vperm.xlu0 %3253, %v1373_v16   ;;  %v1287_v22 = vmul.f32 %v1279_v18, %v1247_v57  ;;  %v1303_v23 = vmul.f32 55.0, %v1279_v18  ;;  %v3276_v16 = vld [vmem:[%s4342_s28 + $0x38] sm:$0xff]   ;;  %v3452_v18 = vmov 1966171168   ;;  %s4067_s8 = sshll.u32 %s4313_s0, 3 }
  0x51   : > { %v1360_v24 = vsel %vm1352_vm9, %v1344_v20, 0.0  ;;  %v927_v20 = vunpack.c.l.s4 %v3452_v18  ;;  %vm1910_vm9 = vcmask 1045509   ;;  %s4314_s6 = scalar_lea.vmem [#allocation4], %s4067_s8 }
  0x52   : > { %v1376_v27 = vmul.f32 %v1368_v21, %v1360_v24  ;;  %v1295_v28 = vmul.f32 %v1287_v22, %v1247_v57  ;;  %v1311_v29 = vsub.f32 1.0, %v1303_v23  ;;  %v1319_v30 = vmul.f32 99.0, %v1287_v22  ;;  %3092 = vmatpush3.bf16.msra.mxu1 %v3270_v12 }
  0x53   : > { %3093 = vmatprep.subr.bf16.mxu1 %v3450_v9  ;;  %v928_v21 = vunpack.c.0.s8 %v927_v20  ;;  %v930_v22 = vshrl.u32 %v869_v39, 7  ;;  %v923_v24 = vunpack.c.l.bf16 %v3718_v42 }
  0x54   : > { %1414 = vperm.xlu1 %3254, %v1376_v27   ;;  %v1327_v31 = vadd.f32 %v1319_v30, %v1311_v29  ;;  %v1335_v32 = vmul.f32 45.0, %v1295_v28 }
  0x55   : > { %v3895_v23 = vsub.s32 %v928_v21, %v930_v22  ;;  %v925_v28 = vcombine.high %v923_v24, %v923_v24 }
  0x56   : > { %v1343_v34 = vsub.f32 %v1327_v31, %v1335_v32  ;;  %3094 = vmatpush3.bf16.msra.mxu1 %v3271_v36 }
  0x57   : > { %3095 = vmatprep.subr.bf16.mxu1 %v3450_v9  ;;  %v932_v27 = vrot.slane %v923_v24, %v3895_v23  ;;  %v939_v32 = vrot.slane %v925_v28, %v3895_v23  ;;  %v2891_v24 = vld [vmem:[%s4344_s10] ss:$0 sm:$0xff]  ;;  %s4350_s10 = scalar_lea.vmem [#allocation4], %s4067_s8 }
  0x58   : > { %v1359_v35 = vsel %vm1351_vm10, %v1343_v34, 0.0  ;;  %vm1912_vm10 = vcmask 1046534  }
  0x59   : > { %v1375_v38 = vmul.f32 %v1367_v33, %v1359_v35  ;;  %v940_v29 = vcombine.high %v932_v27, %v932_v27  ;;  %v948_v30 = vrot.slane %v932_v27, %v3895_v23  ;;  %v3902_v33 = vsub.s32 0, %v930_v22 }
  0x5a   : > { %3096 = vmatpush3.bf16.msra.mxu1 %v3272_v13 }
  0x5b   : > { %1409 = vperm.xlu0 %3253, %v1375_v38   ;;  %3097 = vmatprep.subr.bf16.mxu1 %v3450_v9  ;;  %v962_v31 = vrot.slane %v940_v29, %v3895_v23  ;;  %v970_v34 = vcombine.high %v948_v30, %v948_v30  ;;  %v941_v38 = vcombine.high %v939_v32, %v939_v32 }
  0x5d   : > { %v972_v35 = vcombine.high %v962_v31, %v962_v31  ;;  %v985_v39 = vrot.slane %v970_v34, %v3902_v33 }
  0x5e   : > { %3098 = vmatpush3.bf16.msra.mxu1 %v3273_v14 }
  0x5f   : > { %3099 = vmatprep.subr.bf16.mxu1 %v3450_v9 }
  0x62   : > { %3100 = vmatpush3.bf16.msra.mxu1 %v3274_v15 }
  0x63   : > { %3101 = vmatprep.subr.bf16.mxu1 %v3450_v9 }
  0x66   : > { %3102 = vmatpush3.bf16.msra.mxu1 %v3275_v37 }
  0x67   : > { %3103 = vmatprep.subr.bf16.mxu1 %v3450_v9 }
  0x6a   : > { %3104 = vmatpush3.bf16.msra.mxu1 %v3276_v16 }
  0x6b   : > { %3119 = vmatprep.subr.bf16.mxu1 %v3450_v9 }
  0xab   : > { %v887_v40 = vpop.permute.xlu1 %886 }
  0xac   : > { %v881_v43 = vpop.permute.xlu0 %880  ;;  %vm905_vm12 = vcmp.eq.s32.totalorder %v870_v41, %v887_v40  ;;  %v989_v40 = vrot.slane %v972_v35, %v3902_v33 }
  0xad   : > { %vm903_vm13 = vcmp.eq.s32.totalorder %v870_v41, %v881_v43  ;;  %v913_v45 = vsel %vm905_vm12, 1.0, %v3450_v9  ;;  %v969_v43 = vrot.slane %v941_v38, %v3895_v23  ;;  %vm2196_vm12 = vcmask 523264  }
  0xae   : > { %v911_v46 = vsel %vm903_vm13, 1.0, %v3450_v9 }
  0xaf   : > { %v890_v44 = vpop.permute.xlu1 %889 }
  0xb0   : > { %v884_v17 = vpop.permute.xlu0 %883  ;;  %vm906_vm14 = vcmp.eq.s32.totalorder %v870_v41, %v890_v44 }
  0xb1   : > { %vm904_vm15 = vcmp.eq.s32.totalorder %v870_v41, %v884_v17  ;;  %v914_v47 = vsel %vm906_vm14, 1.0, %v3450_v9  ;;  %v981_v17 = vrot.slane %v962_v31, %v3902_v33 }
  0xb2   : > { %v912_v48 = vsel %vm904_vm15, 1.0, %v3450_v9  ;;  %v3794_v49 = vpack.c.bf16 %v914_v47, %v913_v45 }
  0xb3   : > { %v919_v19 = vpack.c.bf16 %v912_v48, %v911_v46  ;;  %v896_v51 = vpop.permute.xlu1 %895 }
  0xb4   : > { %v893_v53 = vpop.permute.xlu0 %892  ;;  %vm908_vm1 = vcmp.eq.s32.totalorder %v870_v41, %v896_v51 }
  0xb5   : > { %vm907_vm3 = vcmp.eq.s32.totalorder %v870_v41, %v893_v53  ;;  %3049 = vmatprep.mubr.msk.bf16.mxu0 %vm1014_vm0, %v919_v19  ;;  %v916_v54 = vsel %vm908_vm1, 1.0, %v3450_v9  ;;  %v973_v53 = vcombine.high %v969_v43, %v969_v43 }
  0xb6   : > { %v915_v55 = vsel %vm907_vm3, 1.0, %v3450_v9  ;;  %3050 = vmatmul.mubr.msk.bf16.vlgmr.msra.gmra.mrb[0].mxu0 %vm1014_vm0, %v3794_v49 }
  0xb7   : > { %v3804_v56 = vpack.c.bf16 %v916_v54, %v915_v55  ;;  %3070 = vmatpush3.bf16.msra.mxu0 %v3261_v50  ;;  %v902_v57 = vpop.permute.xlu1 %901 }
  0xb8   : > { %v899_v52 = vpop.permute.xlu0 %898  ;;  %3071 = vmatprep.subr.bf16.mxu0 %v3450_v9  ;;  %vm910_vm4 = vcmp.eq.s32.totalorder %v870_v41, %v902_v57  ;;  %v1005_v57 = vrot.slane %v973_v53, %v3902_v33  ;;  %v3997_v53 = vld [vmem:[%s4296_s17] sm:$0xff]  }
  0xb9   : > { %vm909_vm5 = vcmp.eq.s32.totalorder %v870_v41, %v899_v52  ;;  %3053 = vmatprep.mubr.msk.bf16.mxu0 %vm1014_vm0, %v3804_v56  ;;  %v918_v58 = vsel %vm910_vm4, 1.0, %v3450_v9  ;;  %v955_v41 = vrot.slane %v939_v32, %v3895_v23 }
  0xba   : > { %v917_v59 = vsel %vm909_vm5, 1.0, %v3450_v9 }
  0xbb   : > { %v3814_v60 = vpack.c.bf16 %v918_v58, %v917_v59  ;;  %3072 = vmatpush3.bf16.msra.mxu0 %v3262_v25  ;;  %v971_v47 = vcombine.high %v955_v41, %v955_v41  ;;  %v993_v25 = vrot.slane %v955_v41, %v3902_v33  ;;  %v997_v58 = vrot.slane %v969_v43, %v3902_v33 }
  0xbc   : > { %3073 = vmatprep.subr.bf16.mxu0 %v3450_v9 }
  0xbd   : > { %v1001_v55 = vrot.slane %v971_v47, %v3902_v33  ;;  %v3282_v47 = vld [vmem:[%s4345_s11 + $0x28] sm:$0xff]  }
  0xbe   : > { %3054 = vmatmul.mubr.msk.bf16.gmra.mrb[4].mxu0 %vm1014_vm0, %v3814_v60 }
  0xbf   : > { %3074 = vmatpush3.bf16.msra.mxu0 %v3263_v61  ;;  %3085 = vmatprep.mubr.msk.bf16.mxu0 %vm3451_vm11, %v3450_v9 }
  0xc0   : > { %3075 = vmatprep.subr.bf16.mxu0 %v3450_v9 }
  0xc3   : > { %3076 = vmatpush3.bf16.msra.mxu0 %v3264_v62 }
  0xc4   : > { %3077 = vmatprep.subr.bf16.mxu0 %v3450_v9 }
  0xc7   : > { %3078 = vmatpush3.bf16.msra.mxu0 %v3265_v63 }
  0xc8   : > { %3079 = vmatprep.subr.bf16.mxu0 %v3450_v9 }
  0xcb   : > { %3080 = vmatpush3.bf16.msra.mxu0 %v3266_v0 }
  0xcc   : > { %3081 = vmatprep.subr.bf16.mxu0 %v3450_v9 }
  0xcf   : > { %3082 = vmatpush3.bf16.msra.mxu0 %v3267_v1 }
  0xd0   : > { %3083 = vmatprep.subr.bf16.mxu0 %v3450_v9 }
  0xd3   : > { %3084 = vmatpush3.bf16.msra.mxu0 %v3268_v26 }
  0xd6   : > { %3086 = vmatmul.mubr.bf16.vlgmr.msra.gmra.mrb[8].mxu0 %v3718_v42  ;;  %v977_v42 = vrot.slane %v948_v30, %v3902_v33 }
  0xd7   : > { %3111 = vmatprep.mubr.msk.bf16.mxu0 %vm1014_vm0, %v919_v19 }
 0x101   : > { %v3846_v2 = vpop.f32.mrb[0].mxu1 }
 0x102   : > { %v3848_v3 = vpop.f32.mrb[1].mxu1 }
 0x103   : > { %v3850_v4 = vpop.f32.mrb[2].mxu1 }
 0x104   : > { %v3852_v5 = vpop.f32.mrb[3].mxu1 }
 0x109   : > { %v3854_v6 = vpop.f32.mrb[4].mxu1 }
 0x10a   : > { %v3856_v7 = vpop.f32.mrb[5].mxu1 }
 0x10b   : > { %v3858_v8 = vpop.f32.mrb[6].mxu1 }
 0x10c   : > { %v3860_v10 = vpop.f32.mrb[7].mxu1 }
 0x189   : > { %v3051_v44 = vpop.f32.mrb[0].mxu0 }
 0x18a   : > { %v3910_v45 = vmul.f32 %v3051_v44, %v985_v39  ;;  %v1065_v46 = vpop.f32.mrb[1].mxu0 }
 0x18b   : > { %v3912_v48 = vmul.f32 %v1065_v46, %v977_v42  ;;  %v3052_v19 = vpop.f32.mrb[2].mxu0  ;;  %v3277_v46 = vld [vmem:[%s4345_s11] sm:$0xff]  }
 0x18c   : > { %v3914_v50 = vmul.f32 %v3052_v19, %v989_v40  ;;  %v1068_v51 = vpop.f32.mrb[3].mxu0  ;;  %v3283_v19 = vld [vmem:[%s4345_s11 + $0x30] sm:$0xff]  }
 0x18d   : > { %v3916_v54 = vmul.f32 %v1068_v51, %v981_v17  ;;  %v3284_v51 = vld [vmem:[%s4345_s11 + $0x38] sm:$0xff]  }
 0x191   : > { %v3055_v52 = vpop.f32.mrb[4].mxu0 }
 0x192   : > { %v3922_v59 = vmul.f32 %v3055_v52, %v1001_v55  ;;  %v1081_v61 = vpop.f32.mrb[5].mxu0  ;;  %v1380_v55 = vpop.permute.xlu0 %1379 }
 0x193   : > { %v3924_v62 = vmul.f32 %v1081_v61, %v993_v25  ;;  %v3056_v63 = vpop.f32.mrb[6].mxu0  ;;  %v1385_v25 = vpop.permute.xlu1 %1384 }
 0x194   : > { %v3926_v0 = vmul.f32 %v3056_v63, %v1005_v57  ;;  %v1084_v1 = vpop.f32.mrb[7].mxu0 }
 0x195   : > { %v3928_v26 = vmul.f32 %v1084_v1, %v997_v58  ;;  %v2870_v58 = vld [vmem:[%s4346_s4] ss:$0 sm:$0xff]  ;;  %s4222_s4 = scalar_lea.hbm %s4301_s23, %s2963_s30 }
 0x196   : > { %v1390_v57 = vpop.permute.xlu0 %1389 }
 0x197   : > { %v1395_v52 = vpop.permute.xlu1 %1394 }
 0x19a   : > { %v1400_v61 = vpop.permute.xlu0 %1399 }
 0x19b   : > { %v1405_v1 = vpop.permute.xlu1 %1404 }
 0x1a9   : > { %v1530_v12 = vpop.f32.mrb[8].mxu0 }
 0x1aa   : > { %v1531_v36 = vadd.f32 %v2881_v11, %v1530_v12  ;;  %v3087_v13 = vpop.f32.mrb[9].mxu0  ;;  %v1211_v11 = vadd.f32 %v3846_v2, %v2870_v58  ;;  %v1203_v12 = vadd.f32 %v2870_v58, %v3848_v3  ;;  %v1222_v2 = vadd.f32 %v2870_v58, %v3860_v10 }
 0x1ab   : > { %v1533_v14 = vpop.f32.mrb[10].mxu0  ;;  %v1206_v13 = vadd.f32 %v2870_v58, %v3852_v5  ;;  %v1410_v5 = vpop.permute.xlu0 %1409 }
 0x1ac   : > { %v2890_v15 = vmul.f32 -1.442695, %v1531_v36  ;;  %v3088_v37 = vpop.f32.mrb[11].mxu0 }
 0x1ad   : > { %v1219_v37 = vadd.f32 %v2870_v58, %v3856_v7  ;;  %v1415_v7 = vpop.permute.xlu1 %1414 }
 0x1ae   : > { %3309 = vpow2.f32 %v2890_v15  ;;  %v1227_v15 = vadd.f32 %v3854_v6, %v2870_v58 }
 0x1b8   : > { %v3310_v16 = vpop.eup %3309 }
 0x1b9   : > { %v1539_v18 = vadd.f32 1.0, %v3310_v16  ;;  %v1230_v16 = vadd.f32 %v3858_v8, %v2870_v58 }
 0x1bb   : > { %3311 = vrcp.f32 %v1539_v18 }
 0x1c5   : > { %v3312_v20 = vpop.eup %3311 }
 0x1c6   : > { %v1542_v21 = vmul.f32 %v3312_v20, %v1531_v36  ;;  %v1214_v36 = vadd.f32 %v3850_v4, %v2870_v58  ;;  %v1419_v20 = vmul.f32 %v1390_v57, %v1211_v11 }
 0x1c8   : > { %v1543_v22 = vpack.c.bf16 %v1542_v21, %v1542_v21  ;;  %v1417_v21 = vmul.f32 %v1380_v55, %v1203_v12 }
 0x1ca   : > { %3106 = vmatmul.mubr.bf16.vlgmr.msra.gmra.mrb[8].mxu1 %v1543_v22  ;;  %v1420_v22 = vmul.f32 %v1395_v52, %v1214_v36 }
 0x1cb   : > { %3135 = vmatprep.mubr.msk.bf16.mxu1 %vm3451_vm11, %v3450_v9  ;;  %3120 = vmatpush3.bf16.msra.mxu1 %v3277_v46 }
 0x1cc   : > { %3121 = vmatprep.subr.bf16.mxu1 %v3450_v9 }
 0x29d   : > { %v1649_v27 = vpop.f32.mrb[8].mxu1 }
 0x29e   : > { %v1650_v28 = vadd.f32 %v2891_v24, %v1649_v27  ;;  %v3107_v29 = vpop.f32.mrb[9].mxu1  ;;  %v1418_v24 = vmul.f32 %v1385_v25, %v1206_v13 }
 0x29f   : > { %v1652_v30 = vpop.f32.mrb[10].mxu1  ;;  %v1423_v29 = vmul.f32 %v1410_v5, %v1227_v15 }
 0x2a0   : > { %v1656_v31 = vcombine.high %v1650_v28, %v1650_v28  ;;  %v1663_v32 = vrot.slane %v1650_v28, %v3895_v23  ;;  %v1745_v34 = vpack.c.bf16 %v1650_v28, %v1650_v28  ;;  %v3108_v35 = vpop.f32.mrb[11].mxu1 }
 0x2a2   : > { %v1670_v38 = vrot.slane %v1656_v31, %v3895_v23  ;;  %v1671_v39 = vcombine.high %v1663_v32, %v1663_v32  ;;  %3209 = vmatprep.subr.msk.bf16.mxu0 %vm1027_vm2, %v1745_v34  ;;  %v1747_v41 = vsel %vm1027_vm2, %v1745_v34, 0  ;;  %v3943_v42 = vrot.slane %v1663_v32, %v3895_v23 }
 0x2a3   : > { %3110 = vmatpush3.bf16.msra.mxu0 %v1747_v41  ;;  %v1421_v32 = vmul.f32 %v1400_v61, %v1219_v37  ;;  %v1424_v34 = vmul.f32 %v1415_v7, %v1230_v16  ;;  %v1422_v41 = vmul.f32 %v1405_v1, %v1222_v2  ;;  %vm1902_vm2 = vcmask 1041409  }
 0x2a4   : > { %v3946_v40 = vrot.slane %v1671_v39, %v3895_v23  ;;  %v3949_v43 = vrot.slane %v1670_v38, %v3895_v23  ;;  %3139 = vmatprep.subr.bf16.mxu0 %v3450_v9  ;;  %v1672_v44 = vcombine.high %v1670_v38, %v1670_v38  ;;  %v1701_v63 = vcombine.high %v3943_v42, %v3943_v42 }
 0x2a5   : > { %v1708_v4 = vrot.slane %v3943_v42, %v3902_v33 }
 0x2a6   : > { %3112 = vmatmul.mubr.msk.bf16.vlgmr.msra.gmra.mrb[12].mxu0 %vm1014_vm0, %v3794_v49  ;;  %v3957_v17 = vrot.slane %v1672_v44, %v3895_v23  ;;  %v3278_v49 = vld [vmem:[%s4345_s11 + $0x8] sm:$0xff]   ;;  %v3281_v23 = vld [vmem:[%s4345_s11 + $0x20] sm:$0xff]   ;;  %v1703_v14 = vcombine.high %v3946_v40, %v3946_v40  ;;  %v1716_v18 = vrot.slane %v1701_v63, %v3902_v33  ;;  %v1712_v31 = vrot.slane %v3946_v40, %v3902_v33 }
 0x2a7   : > { %3115 = vmatprep.mubr.msk.bf16.mxu0 %vm1014_vm0, %v3804_v56  ;;  %3122 = vmatpush3.bf16.msra.mxu1 %v3278_v49  ;;  %v3279_v56 = vld [vmem:[%s4345_s11 + $0x10] sm:$0xff]   ;;  %v1702_v10 = vcombine.high %v3949_v43, %v3949_v43  ;;  %v1724_v40 = vrot.slane %v3949_v43, %v3902_v33 }
 0x2a8   : > { %3123 = vmatprep.subr.bf16.mxu1 %v3450_v9  ;;  %v1720_v6 = vrot.slane %v1703_v14, %v3902_v33  ;;  %v1704_v46 = vcombine.high %v3957_v17, %v3957_v17 }
 0x2aa   : > { %v1736_v43 = vrot.slane %v1704_v46, %v3902_v33 }
 0x2ab   : > { %3124 = vmatpush3.bf16.msra.mxu1 %v3279_v56 }
 0x2ac   : > { %3125 = vmatprep.subr.bf16.mxu1 %v3450_v9 }
 0x2ae   : > { %3116 = vmatmul.mubr.msk.bf16.gmra.mrb[16].mxu0 %vm1014_vm0, %v3814_v60  ;;  %v3280_v60 = vld [vmem:[%s4345_s11 + $0x18] sm:$0xff]  }
 0x2af   : > { %3155 = vmatprep.mubr.msk.bf16.mxu0 %vm3451_vm11, %v3450_v9  ;;  %3126 = vmatpush3.bf16.msra.mxu1 %v3280_v60  ;;  %vm1914_vm11 = vcmask 1047559  }
 0x2b0   : > { %3127 = vmatprep.subr.bf16.mxu1 %v3450_v9 }
 0x2b3   : > { %3128 = vmatpush3.bf16.msra.mxu1 %v3281_v23 }
 0x2b4   : > { %3129 = vmatprep.subr.bf16.mxu1 %v3450_v9 }
 0x2b7   : > { %3130 = vmatpush3.bf16.msra.mxu1 %v3282_v47 }
 0x2b8   : > { %3131 = vmatprep.subr.bf16.mxu1 %v3450_v9 }
 0x2bb   : > { %3132 = vmatpush3.bf16.msra.mxu1 %v3283_v19  ;;  %v1732_v19 = vrot.slane %v1702_v10, %v3902_v33 }
 0x2bc   : > { %3133 = vmatprep.subr.bf16.mxu1 %v3450_v9 }
 0x2bf   : > { %3134 = vmatpush3.bf16.msra.mxu1 %v3284_v51 }
 0x2c0   : > { %3159 = vmatprep.subr.bf16.mxu1 %v3997_v53 }
 0x379   : > { %v3113_v3 = vpop.f32.mrb[12].mxu0 }
 0x37a   : > { %v1816_v27 = vmul.f32 %v3113_v3, %v1716_v18  ;;  %v1783_v28 = vpop.f32.mrb[13].mxu0 }
 0x37b   : > { %v1814_v8 = vmul.f32 %v1783_v28, %v1708_v4  ;;  %v3114_v30 = vpop.f32.mrb[14].mxu0 }
 0x37c   : > { %v1824_v35 = vmul.f32 %v1816_v27, %v1419_v20  ;;  %v1817_v38 = vmul.f32 %v3114_v30, %v1720_v6  ;;  %v1786_v39 = vpop.f32.mrb[15].mxu0 }
 0x37d   : > { %v1822_v42 = vmul.f32 %v1814_v8, %v1417_v21  ;;  %v1815_v44 = vmul.f32 %v1786_v39, %v1712_v31 }
 0x37e   : > { %v1842_v49 = vrot.slane %v1824_v35, 4  ;;  %v4026_v56 = vadd.f32 %v1824_v35, %v3910_v45  ;;  %v1825_v60 = vmul.f32 %v1817_v38, %v1420_v22  ;;  %v1728_v45 = vrot.slane %v3957_v17, %v3902_v33 }
 0x37f   : > { %v1830_v23 = vrot.slane %v1822_v42, 4  ;;  %v1823_v47 = vmul.f32 %v1815_v44, %v1418_v24  ;;  %v4032_v51 = vadd.f32 %v1822_v42, %v3912_v48 }
 0x380   : > { %v1843_v55 = vadd.f32 %v1842_v49, %v1824_v35  ;;  %v1848_v25 = vrot.slane %v1825_v60, 4  ;;  %v4035_v57 = vadd.f32 %v1825_v60, %v3914_v50 }
 0x381   : > { %v1831_v52 = vadd.f32 %v1830_v23, %v1822_v42  ;;  %v1836_v58 = vrot.slane %v1823_v47, 4  ;;  %v3117_v61 = vpop.f32.mrb[16].mxu0  ;;  %v4041_v63 = vadd.f32 %v1823_v47, %v3916_v54 }
 0x382   : > { %v1844_v1 = vrot.slane %v1843_v55, 2  ;;  %v1849_v11 = vadd.f32 %v1848_v25, %v1825_v60  ;;  %v1820_v48 = vmul.f32 %v3117_v61, %v1732_v19  ;;  %v1799_v12 = vpop.f32.mrb[17].mxu0  ;;  %v2211_v36 = vpack.c.bf16 %v4035_v57, %v4026_v56  ;;  %v3295_v56 = vld [vmem:[%s4347_s13 + $0x10] sm:$0xff]   ;;  %v3296_v57 = vld [vmem:[%s4347_s13 + $0x18] sm:$0xff]  }
 0x383   : > { %v1832_v50 = vrot.slane %v1831_v52, 2  ;;  %v1837_v13 = vadd.f32 %v1836_v58, %v1823_v47  ;;  %v1818_v14 = vmul.f32 %v1799_v12, %v1724_v40  ;;  %v3118_v15 = vpop.f32.mrb[18].mxu0  ;;  %v2210_v17 = vpack.c.bf16 %v4041_v63, %v4032_v51  ;;  %v3290_v51 = vld [vmem:[%s4296_s17 + $0x28] sm:$0xff]   ;;  %v3291_v63 = vld [vmem:[%s4296_s17 + $0x30] sm:$0xff]  }
 0x384   : > { %v1845_v37 = vadd.f32 %v1844_v1, %v1843_v55  ;;  %v1850_v16 = vrot.slane %v1849_v11, 2  ;;  %v1828_v33 = vmul.f32 %v1820_v48, %v1423_v29  ;;  %v1821_v54 = vmul.f32 %v3118_v15, %v1736_v43  ;;  %v1802_v18 = vpop.f32.mrb[19].mxu0 }
 0x385   : > { %v1833_v20 = vadd.f32 %v1832_v50, %v1831_v52  ;;  %v1838_v21 = vrot.slane %v1837_v13, 2  ;;  %v1826_v2 = vmul.f32 %v1818_v14, %v1421_v32  ;;  %v1819_v3 = vmul.f32 %v1802_v18, %v1728_v45 }
 0x386   : > { %v1846_v4 = vrot.slane %v1845_v37, 1  ;;  %v1851_v5 = vadd.f32 %v1850_v16, %v1849_v11  ;;  %v1866_v22 = vrot.slane %v1828_v33, 4  ;;  %v1829_v24 = vmul.f32 %v1821_v54, %v1424_v34 }
 0x387   : > { %v1834_v27 = vrot.slane %v1833_v20, 1  ;;  %v1839_v28 = vadd.f32 %v1838_v21, %v1837_v13  ;;  %v1854_v6 = vrot.slane %v1826_v2, 4  ;;  %v1827_v7 = vmul.f32 %v1819_v3, %v1422_v41 }
 0x388   : > { %v1847_v8 = vadd.f32 %v1846_v4, %v1845_v37  ;;  %v1852_v30 = vrot.slane %v1851_v5, 1  ;;  %v1867_v31 = vadd.f32 %v1866_v22, %v1828_v33  ;;  %v1872_v10 = vrot.slane %v1829_v24, 4 }
 0x389   : > { %v1835_v35 = vadd.f32 %v1834_v27, %v1833_v20  ;;  %v1840_v29 = vrot.slane %v1839_v28, 1  ;;  %v1855_v38 = vadd.f32 %v1854_v6, %v1826_v2  ;;  %v1860_v39 = vrot.slane %v1827_v7, 4 }
 0x38a   : > { %v1880_v42 = vadd.f32 8.0, %v1847_v8  ;;  %v1853_v44 = vadd.f32 %v1852_v30, %v1851_v5  ;;  %v1868_v32 = vrot.slane %v1867_v31, 2  ;;  %v1873_v46 = vadd.f32 %v1872_v10, %v1829_v24 }
 0x38b   : > { %v1878_v49 = vadd.f32 8.0, %v1835_v35  ;;  %v1841_v60 = vadd.f32 %v1840_v29, %v1839_v28  ;;  %v1856_v34 = vrot.slane %v1855_v38, 2  ;;  %v1861_v40 = vadd.f32 %v1860_v39, %v1827_v7 }
 0x38c   : > { %v1920_v23 = vpack.c.bf16 %v1880_v42, %v1880_v42  ;;  %v1881_v41 = vadd.f32 8.0, %v1853_v44  ;;  %v1869_v47 = vadd.f32 %v1868_v32, %v1867_v31  ;;  %v1874_v19 = vrot.slane %v1873_v46, 2 }
 0x38d   : > { %v1918_v55 = vpack.c.bf16 %v1878_v49, %v1878_v49  ;;  %v1879_v25 = vadd.f32 8.0, %v1841_v60  ;;  %v1857_v45 = vadd.f32 %v1856_v34, %v1855_v38  ;;  %v1862_v52 = vrot.slane %v1861_v40, 2 }
 0x38e   : > { %v1959_v58 = vunpack.c.l.b16 %v1920_v23  ;;  %v1921_v61 = vpack.c.bf16 %v1881_v41, %v1881_v41  ;;  %v1870_v43 = vrot.slane %v1869_v47, 1  ;;  %v1875_v1 = vadd.f32 %v1874_v19, %v1873_v46  ;;  %v3288_v19 = vld [vmem:[%s4296_s17 + $0x18] sm:$0xff]  }
 0x38f   : > { %v1957_v11 = vunpack.c.l.b16 %v1918_v55  ;;  %v1903_v48 = vsel %vm1902_vm2, %v1879_v25, %v1878_v49  ;;  %v1919_v12 = vpack.c.bf16 %v1879_v25, %v1879_v25  ;;  %v1858_v50 = vrot.slane %v1857_v45, 1  ;;  %v3293_v55 = vld [vmem:[%s4347_s13] sm:$0xff]   ;;  %v3294_v25 = vld [vmem:[%s4347_s13 + $0x8] sm:$0xff]  }
 0x390   : > { %v1960_v13 = vunpack.c.l.b16 %v1921_v61  ;;  %v1871_v14 = vadd.f32 %v1870_v43, %v1869_v47  ;;  %v1876_v15 = vrot.slane %v1875_v1, 1  ;;  %v1863_v37 = vadd.f32 %v1862_v52, %v1861_v40  ;;  %v3287_v47 = vld [vmem:[%s4296_s17 + $0x10] sm:$0xff]   ;;  %3140 = vmatpush3.bf16.msra.mxu0 %v3293_v55  ;;  %v3301_v61 = vld [vmem:[%s4298_s19] sm:$0xff]  }
 0x391   : > { %v1958_v16 = vunpack.c.l.b16 %v1919_v12  ;;  %v1859_v54 = vadd.f32 %v1858_v50, %v1857_v45  ;;  %v4049_v18 = vadd.f32 %v1826_v2, %v3924_v62  ;;  %v4052_v20 = vadd.f32 %v1827_v7, %v3928_v26  ;;  %3141 = vmatprep.subr.bf16.mxu0 %v3450_v9  ;;  %v3298_v45 = vld [vmem:[%s4347_s13 + $0x28] sm:$0xff]   ;;  %v3299_v52 = vld [vmem:[%s4347_s13 + $0x30] sm:$0xff]   ;;  %v2904_v43 = vld [vmem:[%s4348_s12] ss:$0 sm:$0xff]  ;;  %s3453_s12 = smov [#allocation4]  }
 0x392   : > { %v1884_v21 = vadd.f32 8.0, %v1871_v14  ;;  %v1877_v3 = vadd.f32 %v1876_v15, %v1875_v1  ;;  %v1864_v4 = vrot.slane %v1863_v37, 1  ;;  %v4055_v5 = vadd.f32 %v1828_v33, %v3922_v59 }
 0x393   : > { %v1965_v22 = vsel %vm1902_vm2, %v1958_v16, %v1957_v11  ;;  %v1882_v27 = vadd.f32 8.0, %v1859_v54  ;;  %v2212_v28 = vpack.c.bf16 %v4052_v20, %v4049_v18  ;;  %v1893_v62 = vadd.f32 %v1829_v24, %v3926_v0  ;;  %v2926_v16 = vld [vmem:[%s4297_s18] ss:$0 sm:$0xff]  ;;  %v3302_v18 = vld [vmem:[%s4298_s19 + $0x8] sm:$0xff]  }
 0x394   : > { %v1885_v2 = vadd.f32 8.0, %v1877_v3  ;;  %v1865_v6 = vadd.f32 %v1864_v4, %v1863_v37  ;;  %v1966_v26 = vsel %vm1904_vm6, %v1959_v58, %v1965_v22  ;;  %v1905_v33 = vsel %vm1904_vm6, %v1880_v42, %v1903_v48  ;;  %3142 = vmatpush3.bf16.msra.mxu0 %v3294_v25  ;;  %v3300_v58 = vld [vmem:[%s4347_s13 + $0x38] sm:$0xff]  }
 0x395   : > { %v1922_v7 = vpack.c.bf16 %v1882_v27, %v1882_v27  ;;  %v1967_v8 = vsel %vm1906_vm7, %v1960_v13, %v1966_v26  ;;  %v2213_v59 = vpack.c.bf16 %v1893_v62, %v4055_v5  ;;  %v1907_v0 = vsel %vm1906_vm7, %v1881_v41, %v1905_v33  ;;  %v3286_v41 = vld [vmem:[%s4296_s17 + $0x8] sm:$0xff]   ;;  %3143 = vmatprep.subr.bf16.mxu0 %v3450_v9  ;;  %v3303_v62 = vld [vmem:[%s4298_s19 + $0x10] sm:$0xff]  }
 0x396   : > { %v1883_v30 = vadd.f32 8.0, %v1865_v6  ;;  %v1924_v24 = vpack.c.bf16 %v1884_v21, %v1884_v21  ;;  %v1909_v10 = vsel %vm1908_vm8, %v1882_v27, %v1907_v0  ;;  %v1925_v29 = vpack.c.bf16 %v1885_v2, %v1885_v2 }
 0x397   : > { %v1961_v31 = vunpack.c.l.b16 %v1922_v7 }
 0x398   : > { %v1923_v35 = vpack.c.bf16 %v1883_v30, %v1883_v30  ;;  %v1911_v38 = vsel %vm1910_vm9, %v1883_v30, %v1909_v10  ;;  %v1963_v46 = vunpack.c.l.b16 %v1924_v24  ;;  %v1964_v49 = vunpack.c.l.b16 %v1925_v29  ;;  %3144 = vmatpush3.bf16.msra.mxu0 %v3295_v56  ;;  %v3305_v29 = vld [vmem:[%s4298_s19 + $0x20] sm:$0xff]  }
 0x399   : > { %v1968_v39 = vsel %vm1908_vm8, %v1961_v31, %v1967_v8  ;;  %v1913_v44 = vsel %vm1912_vm10, %v1884_v21, %v1911_v38  ;;  %3145 = vmatprep.subr.bf16.mxu0 %v3450_v9  ;;  %v3304_v8 = vld [vmem:[%s4298_s19 + $0x18] sm:$0xff]  }
 0x39a   : > { %v1962_v42 = vunpack.c.l.b16 %v1923_v35  ;;  %v1915_v32 = vsel %vm1914_vm11, %v1885_v2, %v1913_v44 }
 0x39b   : > { %1917 = vst [vmem:[%s4314_s6] sm:$0xff] %v1915_v32  ;;  %s2687_s6 = sshll.u32 %s4350_s10, 4  ;;  %s2688_s6 = int_to_ptr.vmem [resolvable:$true] %s2687_s6 }
 0x39c   : > { %v1969_v60 = vsel %vm1910_vm9, %v1962_v42, %v1968_v39  ;;  %3146 = vmatpush3.bf16.msra.mxu0 %v3296_v57  ;;  %s3385_s11 = scalar_lea.vmem %s2688_s6, 128 }
 0x39d   : > { %v1970_v34 = vsel %vm1912_vm10, %v1963_v46, %v1969_v60  ;;  %3147 = vmatprep.subr.bf16.mxu0 %v3450_v9  ;;  %v3306_v46 = vld [vmem:[%s4298_s19 + $0x28] sm:$0xff]   ;;  %p3386_p11 = scmp.ne.s32.totalorder %s2688_s6, %s3385_s11 }
 0x39e   : > { %v1971_v40 = vsel %vm1914_vm11, %v1964_v49, %v1970_v34 }
 0x39f   : > { %v1972_v23 = vpack.c.b16 %v1971_v40, %v1971_v40  ;;  %p3387_p12 = pnand %p3386_p11, %p3628_p5 }
 0x3a1   : > { %3136 = vmatmul.mubr.bf16.vlgmr.msra.gmra.mrb[12].mxu1 %v1972_v23  ;;  %p3388_p13 = pneg %p3387_p12 }
 0x3a2   : > { %3160 = vmatpush3.bf16.msra.mxu1 %v3997_v53  ;;  %3175 = vmatprep.mubr.bf16.mxu1 %v2210_v17  ;;  %v3289_v53 = vld [vmem:[%s4296_s17 + $0x20] sm:$0xff]   ;;  %v3292_v17 = vld [vmem:[%s4296_s17 + $0x38] sm:$0xff]  }
 0x3a3   : > { %3161 = vmatprep.subr.bf16.mxu1 %v3286_v41 }
 0x3a6   : > { %3162 = vmatpush3.bf16.msra.mxu1 %v3286_v41 }
 0x3a7   : > { %3163 = vmatprep.subr.bf16.mxu1 %v3287_v47 }
 0x3aa   : > { %3164 = vmatpush3.bf16.msra.mxu1 %v3287_v47 }
 0x3ab   : > { %3165 = vmatprep.subr.bf16.mxu1 %v3288_v19 }
 0x3ae   : > { %3166 = vmatpush3.bf16.msra.mxu1 %v3288_v19  ;;  %v3307_v19 = vld [vmem:[%s4298_s19 + $0x30] sm:$0xff]  }
 0x3af   : > { %3167 = vmatprep.subr.bf16.mxu1 %v3289_v53 }
 0x3b2   : > { %3168 = vmatpush3.bf16.msra.mxu1 %v3289_v53 }
 0x3b3   : > { %3169 = vmatprep.subr.bf16.mxu1 %v3290_v51 }
 0x3b6   : > { %3170 = vmatpush3.bf16.msra.mxu1 %v3290_v51  ;;  %v3308_v51 = vld [vmem:[%s4298_s19 + $0x38] sm:$0xff]  }
 0x3b7   : > { %3171 = vmatprep.subr.bf16.mxu1 %v3291_v63 }
 0x3ba   : > { %3172 = vmatpush3.bf16.msra.mxu1 %v3291_v63 }
 0x3bb   : > { %3173 = vmatprep.subr.bf16.mxu1 %v3292_v17 }
 0x3be   : > { %3174 = vmatpush3.bf16.msra.mxu1 %v3292_v17 }
 0x3c1   : > { %3176 = vmatmul.mubr.bf16.vlgmr.msra.gmra.mrb[16].mxu1 %v2211_v36  ;;  %v3297_v36 = vld [vmem:[%s4347_s13 + $0x20] sm:$0xff]   ;;  %s3389_s13 = sshll.u32 %s3453_s12, 4  ;;  %s3390_s13 = int_to_ptr.vmem [resolvable:$false] %s3389_s13 }
 0x3c2   : > { %3179 = vmatprep.mubr.bf16.mxu1 %v2212_v28  ;;  %3148 = vmatpush3.bf16.msra.mxu0 %v3297_v36  ;;  %p3392_p0 = scmp.lt.s32.totalorder %s2688_s6, %s3390_s13 }
 0x3c3   : > { %3149 = vmatprep.subr.bf16.mxu0 %v3450_v9 }
 0x3c6   : > { %3150 = vmatpush3.bf16.msra.mxu0 %v3298_v45 }
 0x3c7   : > { %3151 = vmatprep.subr.bf16.mxu0 %v3450_v9 }
 0x3c9   : > { %3180 = vmatmul.mubr.bf16.gmra.mrb[20].mxu1 %v2213_v59 }
 0x3ca   : > { %3152 = vmatpush3.bf16.msra.mxu0 %v3299_v52 }
 0x3cb   : > { %3153 = vmatprep.subr.bf16.mxu0 %v3450_v9 }
 0x3ce   : > { %3154 = vmatpush3.bf16.msra.mxu0 %v3300_v58 }
 0x3cf   : > { %3183 = vmatprep.subr.bf16.mxu0 %v3301_v61 }
 0x474   : > { %v2056_v1 = vpop.f32.mrb[12].mxu1 }
 0x475   : > { %v2057_v11 = vadd.f32 %v2904_v43, %v2056_v1  ;;  %v3137_v48 = vpop.f32.mrb[13].mxu1 }
 0x476   : > { %v2059_v12 = vpop.f32.mrb[14].mxu1 }
 0x477   : > { %v2913_v50 = vmul.f32 -1.442695, %v2057_v11  ;;  %v3138_v13 = vpop.f32.mrb[15].mxu1 }
 0x479   : > { %3313 = vpow2.f32 %v2913_v50 }
 0x483   : > { %v3314_v14 = vpop.eup %3313 }
 0x484   : > { %v2065_v15 = vadd.f32 1.0, %v3314_v14 }
 0x486   : > { %3315 = vrcp.f32 %v2065_v15 }
 0x490   : > { %v3316_v9 = vpop.eup %3315 }
 0x491   : > { %v2068_v37 = vmul.f32 %v3316_v9, %v2057_v11 }
 0x493   : > { %v2069_v54 = vpack.c.bf16 %v2068_v37, %v2068_v37 }
 0x494   : > { %v3177_v20 = vpop.f32.mrb[16].mxu1 }
 0x495   : > { %v4151_v21 = vadd.f32 %v3177_v20, %v2926_v16  ;;  %v2319_v3 = vpop.f32.mrb[17].mxu1  ;;  %3156 = vmatmul.mubr.bf16.vlgmr.msra.gmra.mrb[20].mxu0 %v2069_v54 }
 0x496   : > { %v4153_v4 = vadd.f32 %v2926_v16, %v2319_v3  ;;  %v3178_v5 = vpop.f32.mrb[18].mxu1  ;;  %3184 = vmatpush3.bf16.msra.mxu0 %v3301_v61  ;;  %v2914_v3 = vld [vmem:[%s4349_s14] ss:$0 sm:$0xff]  ;;  %s3391_s14 = scalar_lea.vmem %s3390_s13, 256 }
 0x497   : > { %v2937_v22 = vmul.f32 -1.442695, %v4151_v21  ;;  %v4156_v27 = vadd.f32 %v3178_v5, %v2926_v16  ;;  %v2322_v28 = vpop.f32.mrb[19].mxu1  ;;  %3185 = vmatprep.subr.bf16.mxu0 %v3302_v18  ;;  %p3393_p1 = scmp.lt.s32.totalorder %s3391_s14, %s3385_s11 }
 0x498   : > { %v2935_v2 = vmul.f32 -1.442695, %v4153_v4  ;;  %v4162_v6 = vadd.f32 %v2926_v16, %v2322_v28 }
 0x499   : > { %3317 = vpow2.f32 %v2937_v22  ;;  %v2938_v26 = vmul.f32 -1.442695, %v4156_v27  ;;  %p3394_p2 = por %p3393_p1, %p3392_p0 }
 0x49a   : > { %3319 = vpow2.f32 %v2935_v2  ;;  %v2936_v7 = vmul.f32 -1.442695, %v4162_v6  ;;  %3186 = vmatpush3.bf16.msra.mxu0 %v3302_v18 }
 0x49b   : > { %3321 = vpow2.f32 %v2938_v26  ;;  %3187 = vmatprep.subr.bf16.mxu0 %v3303_v62  ;;  %p3395_p3 = pnand %p3394_p2, %p3388_p13 }
 0x49c   : > { %3323 = vpow2.f32 %v2936_v7  ;;  %v3181_v59 = vpop.f32.mrb[20].mxu1  ;;  %v2924_v7 = vld [vmem:[%s4294_s15] ss:$0 sm:$0xff] }
 0x49d   : > { %v4169_v33 = vadd.f32 %v3181_v59, %v2926_v16  ;;  %v2335_v30 = vpop.f32.mrb[21].mxu1 }
 0x49e   : > { %v4171_v0 = vadd.f32 %v2926_v16, %v2335_v30  ;;  %v3182_v24 = vpop.f32.mrb[22].mxu1  ;;  %3188 = vmatpush3.bf16.msra.mxu0 %v3303_v62  ;;  %v2943_v30 = vld [vmem:[%s4299_s20] ss:$0 sm:$0xff] }
 0x49f   : > { %v2941_v31 = vmul.f32 -1.442695, %v4169_v33  ;;  %v4174_v10 = vadd.f32 %v3182_v24, %v2926_v16  ;;  %v2338_v35 = vpop.f32.mrb[23].mxu1  ;;  %3189 = vmatprep.subr.bf16.mxu0 %v3304_v8 }
 0x4a0   : > { %v2939_v38 = vmul.f32 -1.442695, %v4171_v0  ;;  %v2339_v39 = vadd.f32 %v2926_v16, %v2338_v35 }
 0x4a1   : > { %3325 = vpow2.f32 %v2941_v31  ;;  %v2942_v44 = vmul.f32 -1.442695, %v4174_v10 }
 0x4a2   : > { %3327 = vpow2.f32 %v2939_v38  ;;  %v2940_v42 = vmul.f32 -1.442695, %v2339_v39  ;;  %3190 = vmatpush3.bf16.msra.mxu0 %v3304_v8 }
 0x4a3   : > { %v3318_v32 = vpop.eup %3317  ;;  %3329 = vpow2.f32 %v2942_v44  ;;  %3191 = vmatprep.subr.bf16.mxu0 %v3305_v29 }
 0x4a4   : > { %v3320_v49 = vpop.eup %3319  ;;  %v2376_v60 = vadd.f32 1.0, %v3318_v32  ;;  %3331 = vpow2.f32 %v2940_v42 }
 0x4a5   : > { %v3322_v34 = vpop.eup %3321  ;;  %v2374_v40 = vadd.f32 1.0, %v3320_v49 }
 0x4a6   : > { %v3324_v23 = vpop.eup %3323  ;;  %3333 = vrcp.f32 %v2376_v60  ;;  %v2377_v41 = vadd.f32 1.0, %v3322_v34  ;;  %3192 = vmatpush3.bf16.msra.mxu0 %v3305_v29 }
 0x4a7   : > { %3335 = vrcp.f32 %v2374_v40  ;;  %v2375_v47 = vadd.f32 1.0, %v3324_v23  ;;  %3193 = vmatprep.subr.bf16.mxu0 %v3306_v46 }
 0x4a8   : > { %3337 = vrcp.f32 %v2377_v41 }
 0x4a9   : > { %3339 = vrcp.f32 %v2375_v47 }
 0x4aa   : > { %3194 = vmatpush3.bf16.msra.mxu0 %v3306_v46 }
 0x4ab   : > { %v3326_v53 = vpop.eup %3325  ;;  %3195 = vmatprep.subr.bf16.mxu0 %v3307_v19 }
 0x4ac   : > { %v3328_v63 = vpop.eup %3327  ;;  %v2380_v17 = vadd.f32 1.0, %v3326_v53 }
 0x4ad   : > { %v3330_v55 = vpop.eup %3329  ;;  %v2378_v25 = vadd.f32 1.0, %v3328_v63 }
 0x4ae   : > { %v3332_v56 = vpop.eup %3331  ;;  %3341 = vrcp.f32 %v2380_v17  ;;  %v2381_v57 = vadd.f32 1.0, %v3330_v55  ;;  %3196 = vmatpush3.bf16.msra.mxu0 %v3307_v19 }
 0x4af   : > { %3343 = vrcp.f32 %v2378_v25  ;;  %v2379_v36 = vadd.f32 1.0, %v3332_v56  ;;  %3197 = vmatprep.subr.bf16.mxu0 %v3308_v51 }
 0x4b0   : > { %v3334_v45 = vpop.eup %3333  ;;  %3345 = vrcp.f32 %v2381_v57 }
 0x4b1   : > { %v3336_v52 = vpop.eup %3335  ;;  %3347 = vrcp.f32 %v2379_v36  ;;  %v2400_v43 = vmul.f32 %v3334_v45, %v4151_v21 }
 0x4b2   : > { %v3338_v58 = vpop.eup %3337  ;;  %3198 = vmatpush3.bf16.msra.mxu0 %v3308_v51  ;;  %v2398_v11 = vmul.f32 %v3336_v52, %v4153_v4 }
 0x4b3   : > { %v3340_v61 = vpop.eup %3339  ;;  %v2401_v1 = vmul.f32 %v3338_v58, %v4156_v27 }
 0x4b4   : > { %v2399_v48 = vmul.f32 %v3340_v61, %v4162_v6 }
 0x4b5   : > { %v2407_v12 = vpack.c.bf16 %v2401_v1, %v2400_v43 }
 0x4b6   : > { %v2406_v50 = vpack.c.bf16 %v2399_v48, %v2398_v11 }
 0x4b8   : > { %v3342_v13 = vpop.eup %3341  ;;  %3199 = vmatprep.mubr.bf16.mxu0 %v2406_v50 }
 0x4b9   : > { %v3344_v14 = vpop.eup %3343  ;;  %3200 = vmatmul.mubr.bf16.vlgmr.msra.gmra.mrb[24].mxu0 %v2407_v12  ;;  %v2404_v37 = vmul.f32 %v3342_v13, %v4169_v33 }
 0x4ba   : > { %v3346_v15 = vpop.eup %3345  ;;  %v2402_v54 = vmul.f32 %v3344_v14, %v4171_v0 }
 0x4bb   : > { %v3348_v9 = vpop.eup %3347  ;;  %v2405_v16 = vmul.f32 %v3346_v15, %v4174_v10  ;;  %v2960_v15 = vld [vmem:[%s4300_s21] ss:$0 sm:$0xff] }
 0x4bc   : > { %v2403_v18 = vmul.f32 %v3348_v9, %v2339_v39 }
 0x4bd   : > { %v2409_v20 = vpack.c.bf16 %v2405_v16, %v2404_v37 }
 0x4be   : > { %v2408_v21 = vpack.c.bf16 %v2403_v18, %v2402_v54 }
 0x4c0   : > { %3203 = vmatprep.mubr.bf16.mxu0 %v2408_v21 }
 0x4c1   : > { %3204 = vmatmul.mubr.bf16.gmra.mrb[28].mxu0 %v2409_v20 }
 0x568   : > { %v2175_v4 = vpop.f32.mrb[20].mxu0 }
 0x569   : > { %v2176_v5 = vadd.f32 %v2914_v3, %v2175_v4  ;;  %v3157_v22 = vpop.f32.mrb[21].mxu0 }
 0x56a   : > { %v2178_v27 = vpop.f32.mrb[22].mxu0 }
 0x56b   : > { %v2923_v28 = vmul.f32 -1.442695, %v2176_v5  ;;  %v3158_v62 = vpop.f32.mrb[23].mxu0 }
 0x56d   : > { %3349 = vpow2.f32 %v2923_v28 }
 0x577   : > { %v3350_v2 = vpop.eup %3349 }
 0x578   : > { %v2184_v6 = vadd.f32 1.0, %v3350_v2 }
 0x57a   : > { %3351 = vrcp.f32 %v2184_v6 }
 0x584   : > { %v3352_v26 = vpop.eup %3351 }
 0x585   : > { %v2187_v8 = vmul.f32 %v3352_v26, %v2176_v5 }
 0x587   : > { %v2195_v59 = vmul.f32 %v2924_v7, %v2187_v8 }
 0x589   : > { %v2197_v33 = vsel %vm2196_vm12, %v2195_v59, 0.0 }
 0x58a   : > { %2198 = vadd.xlane.f32.xlu0 %v2197_v33 }
 0x58c   : > { %v3201_v0 = vpop.f32.mrb[24].mxu0 }
 0x58d   : > { %v2524_v24 = vadd.f32 %v3201_v0, %v2943_v30  ;;  %v2515_v31 = vpop.f32.mrb[25].mxu0 }
 0x58e   : > { %v2516_v10 = vadd.f32 %v2943_v30, %v2515_v31  ;;  %v3202_v35 = vpop.f32.mrb[26].mxu0 }
 0x58f   : > { %v2954_v29 = vmul.f32 -1.442695, %v2524_v24  ;;  %v2527_v38 = vadd.f32 %v3202_v35, %v2943_v30  ;;  %v2518_v39 = vpop.f32.mrb[27].mxu0 }
 0x590   : > { %v2952_v44 = vmul.f32 -1.442695, %v2516_v10  ;;  %v2519_v42 = vadd.f32 %v2943_v30, %v2518_v39 }
 0x591   : > { %3353 = vpow2.f32 %v2954_v29  ;;  %v2955_v32 = vmul.f32 -1.442695, %v2527_v38 }
 0x592   : > { %3355 = vpow2.f32 %v2952_v44  ;;  %v2953_v46 = vmul.f32 -1.442695, %v2519_v42 }
 0x593   : > { %3357 = vpow2.f32 %v2955_v32 }
 0x594   : > { %3359 = vpow2.f32 %v2953_v46  ;;  %v3205_v49 = vpop.f32.mrb[28].mxu0 }
 0x595   : > { %v2540_v60 = vadd.f32 %v3205_v49, %v2943_v30  ;;  %v2531_v34 = vpop.f32.mrb[29].mxu0 }
 0x596   : > { %v2532_v40 = vadd.f32 %v2943_v30, %v2531_v34  ;;  %v3206_v23 = vpop.f32.mrb[30].mxu0 }
 0x597   : > { %v2958_v41 = vmul.f32 -1.442695, %v2540_v60  ;;  %v2543_v47 = vadd.f32 %v3206_v23, %v2943_v30  ;;  %v2534_v19 = vpop.f32.mrb[31].mxu0 }
 0x598   : > { %v2956_v53 = vmul.f32 -1.442695, %v2532_v40  ;;  %v2535_v51 = vadd.f32 %v2943_v30, %v2534_v19 }
 0x599   : > { %3361 = vpow2.f32 %v2958_v41  ;;  %v2959_v63 = vmul.f32 -1.442695, %v2543_v47 }
 0x59a   : > { %3363 = vpow2.f32 %v2956_v53  ;;  %v2957_v17 = vmul.f32 -1.442695, %v2535_v51 }
 0x59b   : > { %v3354_v55 = vpop.eup %3353  ;;  %3365 = vpow2.f32 %v2959_v63 }
 0x59c   : > { %v3356_v25 = vpop.eup %3355  ;;  %v2572_v56 = vadd.f32 1.0, %v3354_v55  ;;  %3367 = vpow2.f32 %v2957_v17 }
 0x59d   : > { %v3358_v57 = vpop.eup %3357  ;;  %v2570_v36 = vadd.f32 1.0, %v3356_v25 }
 0x59e   : > { %v3360_v45 = vpop.eup %3359  ;;  %3369 = vrcp.f32 %v2572_v56  ;;  %v2573_v52 = vadd.f32 1.0, %v3358_v57 }
 0x59f   : > { %3371 = vrcp.f32 %v2570_v36  ;;  %v2571_v58 = vadd.f32 1.0, %v3360_v45 }
 0x5a0   : > { %3373 = vrcp.f32 %v2573_v52 }
 0x5a1   : > { %3375 = vrcp.f32 %v2571_v58 }
 0x5a3   : > { %v3362_v61 = vpop.eup %3361 }
 0x5a4   : > { %v3364_v43 = vpop.eup %3363  ;;  %v2576_v1 = vadd.f32 1.0, %v3362_v61 }
 0x5a5   : > { %v3366_v11 = vpop.eup %3365  ;;  %v2574_v48 = vadd.f32 1.0, %v3364_v43 }
 0x5a6   : > { %v3368_v12 = vpop.eup %3367  ;;  %3377 = vrcp.f32 %v2576_v1  ;;  %v2577_v50 = vadd.f32 1.0, %v3366_v11 }
 0x5a7   : > { %3379 = vrcp.f32 %v2574_v48  ;;  %v2575_v13 = vadd.f32 1.0, %v3368_v12 }
 0x5a8   : > { %v3370_v14 = vpop.eup %3369  ;;  %3381 = vrcp.f32 %v2577_v50 }
 0x5a9   : > { %v3372_v9 = vpop.eup %3371  ;;  %v2596_v37 = vmul.f32 %v3370_v14, %v2524_v24  ;;  %3383 = vrcp.f32 %v2575_v13 }
 0x5aa   : > { %v3374_v16 = vpop.eup %3373  ;;  %v2594_v54 = vmul.f32 %v3372_v9, %v2516_v10 }
 0x5ab   : > { %v3376_v18 = vpop.eup %3375  ;;  %v2597_v20 = vmul.f32 %v3374_v16, %v2527_v38  ;;  %v2611_v21 = vmul.f32 %v2960_v15, %v2596_v37 }
 0x5ac   : > { %v2595_v3 = vmul.f32 %v3376_v18, %v2519_v42  ;;  %v2609_v4 = vmul.f32 %v2960_v15, %v2594_v54 }
 0x5ad   : > { %v2623_v5 = vsel %vm2196_vm12, %v2611_v21, 0.0  ;;  %v2612_v28 = vmul.f32 %v2960_v15, %v2597_v20 }
 0x5ae   : > { %2624 = vadd.xlane.f32.xlu0 %v2623_v5  ;;  %v2617_v22 = vsel %vm2196_vm12, %v2609_v4, 0.0  ;;  %v2610_v27 = vmul.f32 %v2960_v15, %v2595_v3 }
 0x5af   : > { %2618 = vadd.xlane.f32.xlu1 %v2617_v22  ;;  %v2626_v59 = vsel %vm2196_vm12, %v2612_v28, 0.0 }
 0x5b0   : > { %v3378_v62 = vpop.eup %3377  ;;  %v2620_v2 = vsel %vm2196_vm12, %v2610_v27, 0.0 }
 0x5b1   : > { %v3380_v6 = vpop.eup %3379  ;;  %v2600_v7 = vmul.f32 %v3378_v62, %v2540_v60 }
 0x5b2   : > { %v3382_v26 = vpop.eup %3381  ;;  %v2598_v8 = vmul.f32 %v3380_v6, %v2532_v40  ;;  %2621 = vadd.xlane.f32.xlu0 %v2620_v2 }
 0x5b3   : > { %v3384_v33 = vpop.eup %3383  ;;  %2627 = vadd.xlane.f32.xlu1 %v2626_v59  ;;  %v2601_v30 = vmul.f32 %v3382_v26, %v2543_v47  ;;  %v2615_v35 = vmul.f32 %v2960_v15, %v2600_v7 }
 0x5b4   : > { %v2599_v0 = vmul.f32 %v3384_v33, %v2535_v51  ;;  %v2613_v24 = vmul.f32 %v2960_v15, %v2598_v8 }
 0x5b5   : > { %v2616_v38 = vmul.f32 %v2960_v15, %v2601_v30  ;;  %v2635_v39 = vsel %vm2196_vm12, %v2615_v35, 0.0 }
 0x5b6   : > { %v2629_v31 = vsel %vm2196_vm12, %v2613_v24, 0.0  ;;  %v2614_v10 = vmul.f32 %v2960_v15, %v2599_v0 }
 0x5b7   : > { %2630 = vadd.xlane.f32.xlu0 %v2629_v31  ;;  %v2638_v44 = vsel %vm2196_vm12, %v2616_v38, 0.0 }
 0x5b8   : > { %v2632_v29 = vsel %vm2196_vm12, %v2614_v10, 0.0 }
 0x5b9   : > { %2633 = vadd.xlane.f32.xlu1 %v2632_v29 }
 0x5bb   : > { %2636 = vadd.xlane.f32.xlu0 %v2635_v39 }
 0x5bd   : > { %2639 = vadd.xlane.f32.xlu1 %v2638_v44 }
 0x5be   : > { %3398 = shalt.err (!%p3395_p3)
}
 0x5bf   : > { %s3399_s16 = scalar_lea.hbm %s4222_s4, 128  ;;  %s3403_s12 = scalar_lea.hbm %s4301_s23, 256 }
 0x5c0   : > { %p3400_p4 = scmp.ne.s32.totalorder %s4222_s4, %s3399_s16  ;;  %p3404_p9 = scmp.lt.u32.totalorder %s4222_s4, %s4301_s23 }
 0x5c1   : > { %p3405_p10 = scmp.lt.u32.totalorder %s3403_s12, %s3399_s16  ;;  %p3407_p12 = scmp.lt.u32.totalorder %s3399_s16, %s4222_s4 }
 0x5c2   : > { %p3401_p7 = pnand %p3400_p4, %p3628_p5 }
 0x5c3   : > { %p3406_p11 = por %p3405_p10, %p3404_p9 }
 0x5c4   : > { %p3402_p8 = pneg %p3401_p7 }
 0x5c5   : > { %p3408_p13 = por %p3407_p12, %p3406_p11 }
 0x5c7   : > { %p3409_p0 = pnand %p3408_p13, %p3402_p8 }
 0x5c9   : > { %3412 = shalt.err (!%p3409_p0)
}
 0x5ca   : > { %3210 = dma.vmem_to_hbm [thread:$0]  (%p3628_p5), %s2688_s6, 128, %s4222_s4, %s2665_s26   ;;  %v2925_v42 = vld [vmem:[#allocation2] ss:$0 sm:$0xff]  ;;  %vm2208_vm13 = vcmask 7168   ;;  %v2961_v49 = vld [vmem:[#allocation3] ss:$0 sm:$0xff] }
 0x5cb   : > { %s2863_s11 = sshll.u32 %s3646_s22, 3  ;;  %s866_s9 = scalar_lea.vmem %s4303_s25, %s3649_s27 }
 0x5cc   : > { %s861_s10 = scalar_lea.vmem %s4302_s24, %s2863_s11 }
 0x617   : > { %v2199_v32 = vpop.xlane.xlu0 %2198 }
 0x618   : > { %v2207_v46 = vadd.f32 %v2925_v42, %v2199_v32 }
 0x61a   : > { %2209 = vst.msk [vmem:[%s861_s10] sm:$0xff] %vm2208_vm13, %v2207_v46 }
 0x63b   : > { %v2625_v60 = vpop.xlane.xlu0 %2624 }
 0x63c   : > { %v2650_v34 = vadd.f32 %v2961_v49, %v2625_v60  ;;  %v2619_v40 = vpop.xlane.xlu1 %2618 }
 0x63d   : > { %v2648_v23 = vadd.f32 %v2961_v49, %v2619_v40 }
 0x63e   : > { %2658 = vst.msk [vmem:[%s866_s9 + $0x10] sm:$0xff] %vm2208_vm13, %v2650_v34 }
 0x63f   : > { %2656 = vst.msk [vmem:[%s866_s9] sm:$0xff] %vm2208_vm13, %v2648_v23  ;;  %v2622_v41 = vpop.xlane.xlu0 %2621 }
 0x640   : > { %v2649_v47 = vadd.f32 %v2961_v49, %v2622_v41  ;;  %v2628_v19 = vpop.xlane.xlu1 %2627 }
 0x641   : > { %v2651_v53 = vadd.f32 %v2961_v49, %v2628_v19 }
 0x642   : > { %2657 = vst.msk [vmem:[%s866_s9 + $0x8] sm:$0xff] %vm2208_vm13, %v2649_v47 }
 0x643   : > { %2659 = vst.msk [vmem:[%s866_s9 + $0x18] sm:$0xff] %vm2208_vm13, %v2651_v53 }
 0x644   : > { %v2631_v51 = vpop.xlane.xlu0 %2630 }
 0x645   : > { %v2652_v63 = vadd.f32 %v2961_v49, %v2631_v51 }
 0x646   : > { %v2634_v17 = vpop.xlane.xlu1 %2633 }
 0x647   : > { %2660 = vst.msk [vmem:[%s866_s9 + $0x20] sm:$0xff] %vm2208_vm13, %v2652_v63  ;;  %v2653_v55 = vadd.f32 %v2961_v49, %v2634_v17 }
 0x648   : > { %v2637_v25 = vpop.xlane.xlu0 %2636 }
 0x649   : > { %2661 = vst.msk [vmem:[%s866_s9 + $0x28] sm:$0xff] %vm2208_vm13, %v2653_v55  ;;  %v2654_v56 = vadd.f32 %v2961_v49, %v2637_v25 }
 0x64a   : > { %v2640_v57 = vpop.xlane.xlu1 %2639 }
 0x64b   : > { %2662 = vst.msk [vmem:[%s866_s9 + $0x30] sm:$0xff] %vm2208_vm13, %v2654_v56  ;;  %v2655_v36 = vadd.f32 %v2961_v49, %v2640_v57 }
 0x64d   : > { %2663 = vst.msk [vmem:[%s866_s9 + $0x38] sm:$0xff] %vm2208_vm13, %v2655_v36 }
 0x64e PF: > { %p3216_p5 = scmp.ge.s32.totalorder %s3447_s1, 2  ;;  %s2705_s22 = sand.u32 1, %s3435_s7  }
 0x64f   : > { %s2706_s27 = scalar_lea.sflag [#allocation5], %s2705_s22 }
 0x650   : > { %p3213_p1 = pnand %p3216_p5, %p3632_p6 }
 0x652   : > { %3430 = dma.done.wait (!%p3213_p1), %s2706_s27, 128  }
 0x653   : > { %3432 = vsyncadd (!%p3213_p1), %s2706_s27, 4294967168  ;;  %s4352_s1 = sld [smem:[#allocation8_spill]]  ;;  %s4353_s4 = sld [smem:[#allocation7_spill]] }
 0x654   : > { %s4354_s26 = sld [smem:[#allocation9_spill]]  ;;  %s4355_s7 = smov %s3439_s3 }
 0x659   : > { %p40_p2 = scmp.ge.s32.totalorder %s4352_s1, 4   ;;  %s4356_s3 = smov %s4353_s4 }
 0x65b   :  { %42 = sbr.rel (!%p40_p2) target bundleno = 19 (0x13), region = 183 }
 0x662   :  { %2726 = vsyncpa [#allocation5], 1 }
 0x663   :  { %2728 = vsyncpa [#allocation5 + $0x1], 1 }

</bundles_post_ra>
